<compile_context>
chip_gen: v7x
topology: tpu7x:2x2x1
jax: 0.10.0
libtpu: 0.0.40
codegen_flags: <defaults>
</compile_context>

<pallas_src>
import math

import jax
import jax.numpy as jnp
import numpy as np
from jax.experimental import pallas as pl
from jax.experimental.pallas import tpu as pltpu

# ---------------- configuration (small synthetic shapes) ----------------
B = 2            # batch
D_MODEL = 32     # d_model
NHEAD = 4        # nhead
HEAD_DIM = D_MODEL // NHEAD
DIM_FF = 64      # dim_feedforward
N_Q = 8          # number of query positions (proposals)
N_K = 16         # number of key positions (BEV features)
POS_DIM = 8      # input channels of the learned position embedding MLP
LN_EPS = 1e-5

SLAB_LANES = 128  # lane width of the packed parameter slabs

# Weight slab layout: every weight matrix is stored [in, out], zero-padded to
# 128 columns, and stacked along rows.  Row offsets are static (all multiples
# of 8, so every slice is sublane-aligned).
_W_SPECS = [
    ("spe_w1", POS_DIM, D_MODEL),
    ("spe_w2", D_MODEL, D_MODEL),
    ("cpe_w1", POS_DIM, D_MODEL),
    ("cpe_w2", D_MODEL, D_MODEL),
    ("sa_wqkv", D_MODEL, 3 * D_MODEL),
    ("sa_wo", D_MODEL, D_MODEL),
    ("ca_wqkv", D_MODEL, 3 * D_MODEL),
    ("ca_wo", D_MODEL, D_MODEL),
    ("ffn_w1", D_MODEL, DIM_FF),
    ("ffn_w2", DIM_FF, D_MODEL),
]
W_OFF = {}
_r = 0
for _name, _rows, _cols in _W_SPECS:
    W_OFF[_name] = _r
    _r += _rows
W_ROWS = _r          # 304 rows (multiple of 8)

# Bias/vector slab: one 128-lane row per 1-D parameter (biases, LN gamma/beta).
_B_SPECS = ["spe_b1", "spe_b2", "cpe_b1", "cpe_b2",
            "sa_bqkv", "sa_bo", "ca_bqkv", "ca_bo",
            "ffn_b1", "ffn_b2",
            "n1_g", "n1_b", "n2_g", "n2_b", "n3_g", "n3_b"]
B_ROW = {name: i for i, name in enumerate(_B_SPECS)}
B_ROWS = len(_B_SPECS)   # 16 rows (multiple of 8)


# ---------------- in-kernel math helpers (operate on values) ----------------
def _layer_norm(x, g, b):
    mu = jnp.mean(x, axis=-1, keepdims=True)
    var = jnp.mean(jnp.square(x - mu), axis=-1, keepdims=True)
    return (x - mu) * jax.lax.rsqrt(var + LN_EPS) * g + b


def _pos_mlp(pos, w1, b1, w2, b2):
    # PositionEmbeddingLearned: Conv1d(k=1) -> BN -> ReLU -> Conv1d(k=1)
    # TODO(synk): BatchNorm1d folded to identity (eval mode, running_mean=0,
    # running_var=1, weight=1, bias=0); fold real BN stats into w1/b1 on host.
    h = jnp.maximum(jnp.dot(pos, w1, preferred_element_type=jnp.float32) + b1, 0.0)
    return jnp.dot(h, w2, preferred_element_type=jnp.float32) + b2


def _mha(q_in, kv_in, wqkv, bqkv, wo, bo):
    """nn.MultiheadAttention (eval, no masks) with fused QKV projection and
    head-batched score/value contractions."""
    D = D_MODEL
    if q_in is kv_in:
        # self-attention: one fused QKV matmul (96-wide) instead of 3x 32-wide.
        qkv = jnp.dot(q_in, wqkv, preferred_element_type=jnp.float32) + bqkv
        q, k, v = qkv[:, :D], qkv[:, D:2 * D], qkv[:, 2 * D:3 * D]
    else:
        # cross-attention: Q from query side, fused KV matmul from key side.
        q = jnp.dot(q_in, wqkv[:, :D],
                    preferred_element_type=jnp.float32) + bqkv[:, :D]
        kv = jnp.dot(kv_in, wqkv[:, D:],
                     preferred_element_type=jnp.float32) + bqkv[:, D:]
        k, v = kv[:, :D], kv[:, D:]

    q = q * (1.0 / math.sqrt(HEAD_DIM))

    def split_heads(t):        # [L, D] -> [H, L, HEAD_DIM]  (heads on major axis)
        return jnp.stack(
            [t[:, h * HEAD_DIM:(h + 1) * HEAD_DIM] for h in range(NHEAD)], axis=0)

    qh, kh, vh = split_heads(q), split_heads(k), split_heads(v)

    # one batched contraction over all heads, one batched softmax
    s = jnp.einsum("hqd,hkd->hqk", qh, kh, preferred_element_type=jnp.float32)
    s = s - jnp.max(s, axis=-1, keepdims=True)
    p = jnp.exp(s)
    p = p * pl.reciprocal(jnp.sum(p, axis=-1, keepdims=True), approx=True)
    o = jnp.einsum("hqk,hkd->hqd", p, vh, preferred_element_type=jnp.float32)

    o = jnp.concatenate([o[h] for h in range(NHEAD)], axis=-1)   # [L, D]
    return jnp.dot(o, wo, preferred_element_type=jnp.float32) + bo


# ---------------- the Pallas kernel (one batch element per grid step) -------
def _decoder_layer_kernel(q_ref, k_ref, qpos_ref, kpos_ref, w_ref, b_ref, out_ref):
    D = D_MODEL

    def wmat(name, rows, cols):        # static slice of the weight slab
        off = W_OFF[name]
        return w_ref[off:off + rows, :cols]

    def bvec(name, cols):              # static row of the bias slab -> [1, cols]
        r = B_ROW[name]
        return b_ref[r:r + 1, :cols]

    # channel-first [C, N] tiles -> token-major [N, C] via in-kernel transpose
    query = q_ref[0].T.astype(jnp.float32)     # [N_Q, D]
    key = k_ref[0].T.astype(jnp.float32)       # [N_K, D]
    qpos = qpos_ref[0].astype(jnp.float32)     # [N_Q, P]
    kpos = kpos_ref[0].astype(jnp.float32)     # [N_K, P]

    # learned position embeddings
    qpe = _pos_mlp(qpos, wmat("spe_w1", POS_DIM, D), bvec("spe_b1", D),
                   wmat("spe_w2", D, D), bvec("spe_b2", D))
    kpe = _pos_mlp(kpos, wmat("cpe_w1", POS_DIM, D), bvec("cpe_b1", D),
                   wmat("cpe_w2", D, D), bvec("cpe_b2", D))

    # --- self-attention block ---
    sa_in = query + qpe
    sa = _mha(sa_in, sa_in,
              wmat("sa_wqkv", D, 3 * D), bvec("sa_bqkv", 3 * D),
              wmat("sa_wo", D, D), bvec("sa_bo", D))
    x = _layer_norm(query + sa, bvec("n1_g", D), bvec("n1_b", D))

    # --- cross-attention block ---
    # TODO(synk): key_padding_mask / attn_mask are None in this synthetic setup;
    # add them as an additive bias on the score matrix before softmax if needed.
    kc = key + kpe
    ca = _mha(x + qpe, kc,
              wmat("ca_wqkv", D, 3 * D), bvec("ca_bqkv", 3 * D),
              wmat("ca_wo", D, D), bvec("ca_bo", D))
    x = _layer_norm(x + ca, bvec("n2_g", D), bvec("n2_b", D))

    # --- feed-forward block ---
    h = jnp.maximum(
        jnp.dot(x, wmat("ffn_w1", D, DIM_FF), preferred_element_type=jnp.float32)
        + bvec("ffn_b1", DIM_FF), 0.0)
    ff = jnp.dot(h, wmat("ffn_w2", DIM_FF, D),
                 preferred_element_type=jnp.float32) + bvec("ffn_b2", D)
    x = _layer_norm(x + ff, bvec("n3_g", D), bvec("n3_b", D))

    out_ref[0] = x.T.astype(out_ref.dtype)     # write channel-first [D, N_Q]


# ---------------- wrapper ----------------------------------------------------
def transformer_decoder_layer(query, key, query_pos, key_pos, wslab, bslab):
    """query: [B, C, N_Q], key: [B, C, N_K], query_pos: [B, N_Q, P],
    key_pos: [B, N_K, P].  Returns [B, C, N_Q] (same layout as PyTorch)."""
    bsz = query.shape[0]

    batched = [query, key, query_pos, key_pos]
    in_specs = []
    for a in batched:
        nd = a.ndim
        in_specs.append(pl.BlockSpec(
            (1,) + a.shape[1:], lambda b, _nd=nd: (b,) + (0,) * (_nd - 1)))
    # parameter slabs: constant block index -> fetched once, reused across steps
    in_specs.append(pl.BlockSpec(wslab.shape, lambda b: (0, 0)))
    in_specs.append(pl.BlockSpec(bslab.shape, lambda b: (0, 0)))

    return pl.pallas_call(
        _decoder_layer_kernel,
        grid=(bsz,),
        in_specs=in_specs,
        out_specs=pl.BlockSpec((1, D_MODEL, N_Q), lambda b: (b, 0, 0)),
        out_shape=jax.ShapeDtypeStruct((bsz, D_MODEL, N_Q), jnp.float32),
        compiler_params=pltpu.CompilerParams(
            # batch elements are independent -> shard across the 2 TCs on v7x
            dimension_semantics=("parallel",)),
    )(query, key, query_pos, key_pos, wslab, bslab)


# ---------------- host-side parameter packing --------------------------------
def pack_params(p):
    """Pack all weights into one [W_ROWS, 128] slab and all 1-D params into one
    [B_ROWS, 128] slab -> 2 parameter DMAs instead of 34."""
    wslab = np.zeros((W_ROWS, SLAB_LANES), np.float32)

    def put_w(name, arr):
        arr = np.asarray(arr, np.float32)
        off = W_OFF[name]
        wslab[off:off + arr.shape[0], :arr.shape[1]] = arr

    put_w("spe_w1", p["spe_w1"]); put_w("spe_w2", p["spe_w2"])
    put_w("cpe_w1", p["cpe_w1"]); put_w("cpe_w2", p["cpe_w2"])
    put_w("sa_wqkv", np.concatenate(
        [np.asarray(p["sa_wq"]), np.asarray(p["sa_wk"]), np.asarray(p["sa_wv"])],
        axis=1))
    put_w("sa_wo", p["sa_wo"])
    put_w("ca_wqkv", np.concatenate(
        [np.asarray(p["ca_wq"]), np.asarray(p["ca_wk"]), np.asarray(p["ca_wv"])],
        axis=1))
    put_w("ca_wo", p["ca_wo"])
    put_w("ffn_w1", p["ffn_w1"]); put_w("ffn_w2", p["ffn_w2"])

    bslab = np.zeros((B_ROWS, SLAB_LANES), np.float32)

    def put_b(name, arr):
        arr = np.asarray(arr, np.float32).reshape(-1)
        bslab[B_ROW[name], :arr.shape[0]] = arr

    put_b("spe_b1", p["spe_b1"]); put_b("spe_b2", p["spe_b2"])
    put_b("cpe_b1", p["cpe_b1"]); put_b("cpe_b2", p["cpe_b2"])
    put_b("sa_bqkv", np.concatenate(
        [np.asarray(p["sa_bq"]).ravel(), np.asarray(p["sa_bk"]).ravel(),
         np.asarray(p["sa_bv"]).ravel()]))
    put_b("sa_bo", p["sa_bo"])
    put_b("ca_bqkv", np.concatenate(
        [np.asarray(p["ca_bq"]).ravel(), np.asarray(p["ca_bk"]).ravel(),
         np.asarray(p["ca_bv"]).ravel()]))
    put_b("ca_bo", p["ca_bo"])
    put_b("ffn_b1", p["ffn_b1"]); put_b("ffn_b2", p["ffn_b2"])
    for i in (1, 2, 3):
        put_b(f"n{i}_g", p[f"n{i}_g"]); put_b(f"n{i}_b", p[f"n{i}_b"])

    return jnp.asarray(wslab), jnp.asarray(bslab)


# ---------------- deterministic parameter init --------------------------------
def init_params(rng):
    keys = iter(jax.random.split(rng, 64))

    def w(shape, scale=0.08):
        return jax.random.normal(next(keys), shape, jnp.float32) * scale

    p = {}
    # pos embeds (Conv1d k=1 ≡ Linear), weights stored [in, out]
    p["spe_w1"], p["spe_b1"] = w((POS_DIM, D_MODEL)), w((1, D_MODEL))
    p["spe_w2"], p["spe_b2"] = w((D_MODEL, D_MODEL)), w((1, D_MODEL))
    p["cpe_w1"], p["cpe_b1"] = w((POS_DIM, D_MODEL)), w((1, D_MODEL))
    p["cpe_w2"], p["cpe_b2"] = w((D_MODEL, D_MODEL)), w((1, D_MODEL))
    # self / cross attention (in_proj split into q/k/v; weights stored [in, out])
    for pref in ("sa", "ca"):
        p[f"{pref}_wq"], p[f"{pref}_bq"] = w((D_MODEL, D_MODEL)), w((1, D_MODEL))
        p[f"{pref}_wk"], p[f"{pref}_bk"] = w((D_MODEL, D_MODEL)), w((1, D_MODEL))
        p[f"{pref}_wv"], p[f"{pref}_bv"] = w((D_MODEL, D_MODEL)), w((1, D_MODEL))
        p[f"{pref}_wo"], p[f"{pref}_bo"] = w((D_MODEL, D_MODEL)), w((1, D_MODEL))
    # FFN
    p["ffn_w1"], p["ffn_b1"] = w((D_MODEL, DIM_FF)), w((1, DIM_FF))
    p["ffn_w2"], p["ffn_b2"] = w((DIM_FF, D_MODEL)), w((1, D_MODEL))
    # LayerNorms
    for i in (1, 2, 3):
        p[f"n{i}_g"] = jnp.ones((1, D_MODEL), jnp.float32)
        p[f"n{i}_b"] = jnp.zeros((1, D_MODEL), jnp.float32)
    return p


# ---------------- plain-JAX reference (for correctness check) -----------------
def reference_forward(query, key, qpos, kpos, p):
    def pos_mlp(pos, w1, b1, w2, b2):
        return jnp.maximum(pos @ w1 + b1, 0.0) @ w2 + b2

    def ln(x, g, b):
        mu = x.mean(-1, keepdims=True)
        var = ((x - mu) ** 2).mean(-1, keepdims=True)
        return (x - mu) / jnp.sqrt(var + LN_EPS) * g + b

    def mha(qi, ki, vi, pre):
        q = qi @ p[f"{pre}_wq"] + p[f"{pre}_bq"]
        k = ki @ p[f"{pre}_wk"] + p[f"{pre}_bk"]
        v = vi @ p[f"{pre}_wv"] + p[f"{pre}_bv"]
        Lq, Lk = q.shape[0], k.shape[0]
        qh = q.reshape(Lq, NHEAD, HEAD_DIM)
        kh = k.reshape(Lk, NHEAD, HEAD_DIM)
        vh = v.reshape(Lk, NHEAD, HEAD_DIM)
        s = jnp.einsum("qhd,khd->hqk", qh, kh) / math.sqrt(HEAD_DIM)
        a = jax.nn.softmax(s, axis=-1)
        o = jnp.einsum("hqk,khd->qhd", a, vh).reshape(Lq, D_MODEL)
        return o @ p[f"{pre}_wo"] + p[f"{pre}_bo"]

    outs = []
    for b in range(query.shape[0]):
        x = query[b].T      # [N_Q, C]
        kx = key[b].T       # [N_K, C]
        qpe = pos_mlp(qpos[b], p["spe_w1"], p["spe_b1"], p["spe_w2"], p["spe_b2"])
        kpe = pos_mlp(kpos[b], p["cpe_w1"], p["cpe_b1"], p["cpe_w2"], p["cpe_b2"])
        qkv = x + qpe
        x = ln(x + mha(qkv, qkv, qkv, "sa"), p["n1_g"], p["n1_b"])
        kc = kx + kpe
        x = ln(x + mha(x + qpe, kc, kc, "ca"), p["n2_g"], p["n2_b"])
        h = jnp.maximum(x @ p["ffn_w1"] + p["ffn_b1"], 0.0)
        x = ln(x + h @ p["ffn_w2"] + p["ffn_b2"], p["n3_g"], p["n3_b"])
        outs.append(x.T)
    return jnp.stack(outs, 0)


# ---------------- main --------------------------------------------------------
if __name__ == "__main__":
    root = jax.random.PRNGKey(0)
    k_q, k_k, k_qp, k_kp, k_par = jax.random.split(root, 5)

    query = jax.random.normal(k_q, (B, D_MODEL, N_Q), jnp.float32)
    key = jax.random.normal(k_k, (B, D_MODEL, N_K), jnp.float32)
    query_pos = jax.random.normal(k_qp, (B, N_Q, POS_DIM), jnp.float32)
    key_pos = jax.random.normal(k_kp, (B, N_K, POS_DIM), jnp.float32)
    params = init_params(k_par)
    wslab, bslab = pack_params(params)

    out = transformer_decoder_layer(query, key, query_pos, key_pos, wslab, bslab)
    out = jax.block_until_ready(out)

    ref = reference_forward(query, key, query_pos, key_pos, params)
    assert out.shape == (B, D_MODEL, N_Q), out.shape
    # tolerance slightly loosened vs exact math because the softmax denominator
    # uses the EUP approximate reciprocal (pl.reciprocal(..., approx=True)).
    assert np.allclose(np.asarray(out), np.asarray(ref), atol=2e-3, rtol=2e-3), (
        "Pallas kernel output does not match JAX reference; max abs err = "
        + str(float(np.max(np.abs(np.asarray(out) - np.asarray(ref))))))

    print("KERNEL_OK")
</pallas_src>

<mosaic_0001>
module attributes {stable_mosaic.version = 11 : i64} {
  func.func @_decoder_layer_kernel(%arg0: i32, %arg1: memref<1x32x8xf32, #tpu.memory_space<vmem>>, %arg2: memref<1x32x16xf32, #tpu.memory_space<vmem>>, %arg3: memref<1x8x8xf32, #tpu.memory_space<vmem>>, %arg4: memref<1x16x8xf32, #tpu.memory_space<vmem>>, %arg5: memref<304x128xf32, #tpu.memory_space<vmem>>, %arg6: memref<16x128xf32, #tpu.memory_space<vmem>>, %arg7: memref<1x32x8xf32, #tpu.memory_space<vmem>>) attributes {dimension_semantics = [#tpu.dimension_semantics<parallel>], iteration_bounds = array<i64: 2>, scalar_prefetch = 0 : i64, scratch_operands = 0 : i64, tpu.core_type = #tpu.core_type<tc>, window_params = [{transform_indices = @transform_0, window_bounds = array<i64: 1, 32, 8>}, {transform_indices = @transform_1, window_bounds = array<i64: 1, 32, 16>}, {transform_indices = @transform_2, window_bounds = array<i64: 1, 8, 8>}, {transform_indices = @transform_3, window_bounds = array<i64: 1, 16, 8>}, {pipeline_mode = #tpu.pipeline_mode<synchronous>, transform_indices = @transform_4, window_bounds = array<i64: 304, 128>}, {pipeline_mode = #tpu.pipeline_mode<synchronous>, transform_indices = @transform_5, window_bounds = array<i64: 16, 128>}, {transform_indices = @transform_6, window_bounds = array<i64: 1, 32, 8>}]} {
    %c0 = arith.constant 0 : index
    %c0_0 = arith.constant 0 : index
    %c0_1 = arith.constant 0 : index
    %0 = vector.load %arg1[%c0, %c0_0, %c0_1] : memref<1x32x8xf32, #tpu.memory_space<vmem>>, vector<1x32x8xf32>
    %1 = vector.shape_cast %0 : vector<1x32x8xf32> to vector<32x8xf32>
    %2 = tpu.transpose %1, [1, 0] : vector<32x8xf32> -> vector<8x32xf32>
    %c0_2 = arith.constant 0 : index
    %c0_3 = arith.constant 0 : index
    %c0_4 = arith.constant 0 : index
    %3 = vector.load %arg2[%c0_2, %c0_3, %c0_4] : memref<1x32x16xf32, #tpu.memory_space<vmem>>, vector<1x32x16xf32>
    %4 = vector.shape_cast %3 : vector<1x32x16xf32> to vector<32x16xf32>
    %5 = tpu.transpose %4, [1, 0] : vector<32x16xf32> -> vector<16x32xf32>
    %c0_5 = arith.constant 0 : index
    %c0_6 = arith.constant 0 : index
    %c0_7 = arith.constant 0 : index
    %6 = vector.load %arg3[%c0_5, %c0_6, %c0_7] : memref<1x8x8xf32, #tpu.memory_space<vmem>>, vector<1x8x8xf32>
    %7 = vector.shape_cast %6 : vector<1x8x8xf32> to vector<8x8xf32>
    %c0_8 = arith.constant 0 : index
    %c0_9 = arith.constant 0 : index
    %c0_10 = arith.constant 0 : index
    %8 = vector.load %arg4[%c0_8, %c0_9, %c0_10] : memref<1x16x8xf32, #tpu.memory_space<vmem>>, vector<1x16x8xf32>
    %9 = vector.shape_cast %8 : vector<1x16x8xf32> to vector<16x8xf32>
    %c0_11 = arith.constant 0 : index
    %c0_12 = arith.constant 0 : index
    %10 = vector.load %arg5[%c0_11, %c0_12] : memref<304x128xf32, #tpu.memory_space<vmem>>, vector<8x32xf32>
    %c0_13 = arith.constant 0 : index
    %c0_14 = arith.constant 0 : index
    %11 = vector.load %arg6[%c0_13, %c0_14] : memref<16x128xf32, #tpu.memory_space<vmem>>, vector<1x32xf32>
    %c8 = arith.constant 8 : index
    %c0_15 = arith.constant 0 : index
    %12 = vector.load %arg5[%c8, %c0_15] : memref<304x128xf32, #tpu.memory_space<vmem>>, vector<32x32xf32>
    %c1 = arith.constant 1 : index
    %c0_16 = arith.constant 0 : index
    %13 = vector.load %arg6[%c1, %c0_16] : memref<16x128xf32, #tpu.memory_space<vmem>>, vector<1x32xf32>
    %cst = arith.constant dense<0.000000e+00> : vector<8x32xf32>
    %14 = tpu.matmul %7, %10, %cst {dimension_numbers = #tpu.dot_dimension_numbers<[1], [0], [0], [1], [0, 0, 1, 1], [], []>} : vector<8x8xf32>, vector<8x32xf32>, vector<8x32xf32> -> vector<8x32xf32>
    %15 = vector.broadcast %11 : vector<1x32xf32> to vector<8x32xf32>
    %16 = arith.addf %14, %15 : vector<8x32xf32>
    %cst_17 = arith.constant 0.000000e+00 : f32
    %17 = vector.broadcast %cst_17 : f32 to vector<8x32xf32>
    %18 = arith.maximumf %16, %17 : vector<8x32xf32>
    %cst_18 = arith.constant dense<0.000000e+00> : vector<8x32xf32>
    %19 = tpu.matmul %18, %12, %cst_18 {dimension_numbers = #tpu.dot_dimension_numbers<[1], [0], [0], [1], [0, 0, 1, 1], [], []>} : vector<8x32xf32>, vector<32x32xf32>, vector<8x32xf32> -> vector<8x32xf32>
    %20 = vector.broadcast %13 : vector<1x32xf32> to vector<8x32xf32>
    %21 = arith.addf %19, %20 : vector<8x32xf32>
    %c40 = arith.constant 40 : index
    %c0_19 = arith.constant 0 : index
    %22 = vector.load %arg5[%c40, %c0_19] : memref<304x128xf32, #tpu.memory_space<vmem>>, vector<8x32xf32>
    %c2 = arith.constant 2 : index
    %c0_20 = arith.constant 0 : index
    %23 = vector.load %arg6[%c2, %c0_20] : memref<16x128xf32, #tpu.memory_space<vmem>>, vector<1x32xf32>
    %c48 = arith.constant 48 : index
    %c0_21 = arith.constant 0 : index
    %24 = vector.load %arg5[%c48, %c0_21] : memref<304x128xf32, #tpu.memory_space<vmem>>, vector<32x32xf32>
    %c3 = arith.constant 3 : index
    %c0_22 = arith.constant 0 : index
    %25 = vector.load %arg6[%c3, %c0_22] : memref<16x128xf32, #tpu.memory_space<vmem>>, vector<1x32xf32>
    %cst_23 = arith.constant dense<0.000000e+00> : vector<16x32xf32>
    %26 = tpu.matmul %9, %22, %cst_23 {dimension_numbers = #tpu.dot_dimension_numbers<[1], [0], [0], [1], [0, 0, 1, 1], [], []>} : vector<16x8xf32>, vector<8x32xf32>, vector<16x32xf32> -> vector<16x32xf32>
    %27 = vector.broadcast %23 : vector<1x32xf32> to vector<16x32xf32>
    %28 = arith.addf %26, %27 : vector<16x32xf32>
    %cst_24 = arith.constant 0.000000e+00 : f32
    %29 = vector.broadcast %cst_24 : f32 to vector<16x32xf32>
    %30 = arith.maximumf %28, %29 : vector<16x32xf32>
    %cst_25 = arith.constant dense<0.000000e+00> : vector<16x32xf32>
    %31 = tpu.matmul %30, %24, %cst_25 {dimension_numbers = #tpu.dot_dimension_numbers<[1], [0], [0], [1], [0, 0, 1, 1], [], []>} : vector<16x32xf32>, vector<32x32xf32>, vector<16x32xf32> -> vector<16x32xf32>
    %32 = vector.broadcast %25 : vector<1x32xf32> to vector<16x32xf32>
    %33 = arith.addf %31, %32 : vector<16x32xf32>
    %34 = arith.addf %2, %21 : vector<8x32xf32>
    %c80 = arith.constant 80 : index
    %c0_26 = arith.constant 0 : index
    %35 = vector.load %arg5[%c80, %c0_26] : memref<304x128xf32, #tpu.memory_space<vmem>>, vector<32x96xf32>
    %c4 = arith.constant 4 : index
    %c0_27 = arith.constant 0 : index
    %36 = vector.load %arg6[%c4, %c0_27] : memref<16x128xf32, #tpu.memory_space<vmem>>, vector<1x96xf32>
    %c112 = arith.constant 112 : index
    %c0_28 = arith.constant 0 : index
    %37 = vector.load %arg5[%c112, %c0_28] : memref<304x128xf32, #tpu.memory_space<vmem>>, vector<32x32xf32>
    %c5 = arith.constant 5 : index
    %c0_29 = arith.constant 0 : index
    %38 = vector.load %arg6[%c5, %c0_29] : memref<16x128xf32, #tpu.memory_space<vmem>>, vector<1x32xf32>
    %cst_30 = arith.constant dense<0.000000e+00> : vector<8x96xf32>
    %39 = tpu.matmul %34, %35, %cst_30 {dimension_numbers = #tpu.dot_dimension_numbers<[1], [0], [0], [1], [0, 0, 1, 1], [], []>} : vector<8x32xf32>, vector<32x96xf32>, vector<8x96xf32> -> vector<8x96xf32>
    %40 = vector.broadcast %36 : vector<1x96xf32> to vector<8x96xf32>
    %41 = arith.addf %39, %40 : vector<8x96xf32>
    %42 = vector.extract_strided_slice %41 {offsets = [0, 0], sizes = [8, 32], strides = [1, 1]} : vector<8x96xf32> to vector<8x32xf32>
    %43 = vector.extract_strided_slice %41 {offsets = [0, 32], sizes = [8, 32], strides = [1, 1]} : vector<8x96xf32> to vector<8x32xf32>
    %44 = vector.extract_strided_slice %41 {offsets = [0, 64], sizes = [8, 32], strides = [1, 1]} : vector<8x96xf32> to vector<8x32xf32>
    %cst_31 = arith.constant 0.353553385 : f32
    %45 = vector.broadcast %cst_31 : f32 to vector<8x32xf32>
    %46 = arith.mulf %42, %45 : vector<8x32xf32>
    %47 = vector.extract_strided_slice %46 {offsets = [0, 0], sizes = [8, 8], strides = [1, 1]} : vector<8x32xf32> to vector<8x8xf32>
    %48 = vector.extract_strided_slice %46 {offsets = [0, 8], sizes = [8, 8], strides = [1, 1]} : vector<8x32xf32> to vector<8x8xf32>
    %49 = vector.extract_strided_slice %46 {offsets = [0, 16], sizes = [8, 8], strides = [1, 1]} : vector<8x32xf32> to vector<8x8xf32>
    %50 = vector.extract_strided_slice %46 {offsets = [0, 24], sizes = [8, 8], strides = [1, 1]} : vector<8x32xf32> to vector<8x8xf32>
    %51 = vector.shape_cast %47 : vector<8x8xf32> to vector<1x8x8xf32>
    %52 = vector.shape_cast %48 : vector<8x8xf32> to vector<1x8x8xf32>
    %53 = vector.shape_cast %49 : vector<8x8xf32> to vector<1x8x8xf32>
    %54 = vector.shape_cast %50 : vector<8x8xf32> to vector<1x8x8xf32>
    %55 = tpu.concatenate %51, %52, %53, %54 in 0 : vector<1x8x8xf32>, vector<1x8x8xf32>, vector<1x8x8xf32>, vector<1x8x8xf32> -> vector<4x8x8xf32>
    %56 = vector.extract_strided_slice %43 {offsets = [0, 0], sizes = [8, 8], strides = [1, 1]} : vector<8x32xf32> to vector<8x8xf32>
    %57 = vector.extract_strided_slice %43 {offsets = [0, 8], sizes = [8, 8], strides = [1, 1]} : vector<8x32xf32> to vector<8x8xf32>
    %58 = vector.extract_strided_slice %43 {offsets = [0, 16], sizes = [8, 8], strides = [1, 1]} : vector<8x32xf32> to vector<8x8xf32>
    %59 = vector.extract_strided_slice %43 {offsets = [0, 24], sizes = [8, 8], strides = [1, 1]} : vector<8x32xf32> to vector<8x8xf32>
    %60 = vector.shape_cast %56 : vector<8x8xf32> to vector<1x8x8xf32>
    %61 = vector.shape_cast %57 : vector<8x8xf32> to vector<1x8x8xf32>
    %62 = vector.shape_cast %58 : vector<8x8xf32> to vector<1x8x8xf32>
    %63 = vector.shape_cast %59 : vector<8x8xf32> to vector<1x8x8xf32>
    %64 = tpu.concatenate %60, %61, %62, %63 in 0 : vector<1x8x8xf32>, vector<1x8x8xf32>, vector<1x8x8xf32>, vector<1x8x8xf32> -> vector<4x8x8xf32>
    %65 = vector.extract_strided_slice %44 {offsets = [0, 0], sizes = [8, 8], strides = [1, 1]} : vector<8x32xf32> to vector<8x8xf32>
    %66 = vector.extract_strided_slice %44 {offsets = [0, 8], sizes = [8, 8], strides = [1, 1]} : vector<8x32xf32> to vector<8x8xf32>
    %67 = vector.extract_strided_slice %44 {offsets = [0, 16], sizes = [8, 8], strides = [1, 1]} : vector<8x32xf32> to vector<8x8xf32>
    %68 = vector.extract_strided_slice %44 {offsets = [0, 24], sizes = [8, 8], strides = [1, 1]} : vector<8x32xf32> to vector<8x8xf32>
    %69 = vector.shape_cast %65 : vector<8x8xf32> to vector<1x8x8xf32>
    %70 = vector.shape_cast %66 : vector<8x8xf32> to vector<1x8x8xf32>
    %71 = vector.shape_cast %67 : vector<8x8xf32> to vector<1x8x8xf32>
    %72 = vector.shape_cast %68 : vector<8x8xf32> to vector<1x8x8xf32>
    %73 = tpu.concatenate %69, %70, %71, %72 in 0 : vector<1x8x8xf32>, vector<1x8x8xf32>, vector<1x8x8xf32>, vector<1x8x8xf32> -> vector<4x8x8xf32>
    "tpu.trace_start"() <{level = 10 : i32, message = "hqd,hkd->hqk"}> : () -> ()
    %cst_32 = arith.constant dense<0.000000e+00> : vector<4x8x8xf32>
    %74 = tpu.matmul %55, %64, %cst_32 {dimension_numbers = #tpu.dot_dimension_numbers<[2], [2], [1], [1], [0, 0, 0, 1, 1, 1], [0], [0]>} : vector<4x8x8xf32>, vector<4x8x8xf32>, vector<4x8x8xf32> -> vector<4x8x8xf32>
    "tpu.trace_stop"() : () -> ()
    %cst_33 = arith.constant dense<0xFF800000> : vector<4x8xf32>
    %75 = vector.multi_reduction <maximumf>, %74, %cst_33 [2] : vector<4x8x8xf32> to vector<4x8xf32>
    %76 = vector.shape_cast %75 : vector<4x8xf32> to vector<4x8x1xf32>
    %77 = vector.broadcast %76 : vector<4x8x1xf32> to vector<4x8x8xf32>
    %78 = arith.subf %74, %77 : vector<4x8x8xf32>
    %79 = math.exp %78 : vector<4x8x8xf32>
    %cst_34 = arith.constant dense<0.000000e+00> : vector<4x8xf32>
    %80 = vector.multi_reduction <add>, %79, %cst_34 [2] : vector<4x8x8xf32> to vector<4x8xf32>
    %81 = vector.shape_cast %80 : vector<4x8xf32> to vector<4x8x1xf32>
    %82 = tpu.reciprocal %81 {approx = true} : vector<4x8x1xf32> -> vector<4x8x1xf32>
    %83 = vector.broadcast %82 : vector<4x8x1xf32> to vector<4x8x8xf32>
    %84 = arith.mulf %79, %83 : vector<4x8x8xf32>
    "tpu.trace_start"() <{level = 10 : i32, message = "hqk,hkd->hqd"}> : () -> ()
    %cst_35 = arith.constant dense<0.000000e+00> : vector<4x8x8xf32>
    %85 = tpu.matmul %84, %73, %cst_35 {dimension_numbers = #tpu.dot_dimension_numbers<[2], [1], [1], [2], [0, 0, 0, 1, 1, 2], [0], [0]>} : vector<4x8x8xf32>, vector<4x8x8xf32>, vector<4x8x8xf32> -> vector<4x8x8xf32>
    "tpu.trace_stop"() : () -> ()
    %86 = vector.extract_strided_slice %85 {offsets = [0, 0, 0], sizes = [1, 8, 8], strides = [1, 1, 1]} : vector<4x8x8xf32> to vector<1x8x8xf32>
    %87 = vector.shape_cast %86 : vector<1x8x8xf32> to vector<8x8xf32>
    %88 = vector.extract_strided_slice %85 {offsets = [1, 0, 0], sizes = [1, 8, 8], strides = [1, 1, 1]} : vector<4x8x8xf32> to vector<1x8x8xf32>
    %89 = vector.shape_cast %88 : vector<1x8x8xf32> to vector<8x8xf32>
    %90 = vector.extract_strided_slice %85 {offsets = [2, 0, 0], sizes = [1, 8, 8], strides = [1, 1, 1]} : vector<4x8x8xf32> to vector<1x8x8xf32>
    %91 = vector.shape_cast %90 : vector<1x8x8xf32> to vector<8x8xf32>
    %92 = vector.extract_strided_slice %85 {offsets = [3, 0, 0], sizes = [1, 8, 8], strides = [1, 1, 1]} : vector<4x8x8xf32> to vector<1x8x8xf32>
    %93 = vector.shape_cast %92 : vector<1x8x8xf32> to vector<8x8xf32>
    %94 = tpu.concatenate %87, %89, %91, %93 in 1 : vector<8x8xf32>, vector<8x8xf32>, vector<8x8xf32>, vector<8x8xf32> -> vector<8x32xf32>
    %cst_36 = arith.constant dense<0.000000e+00> : vector<8x32xf32>
    %95 = tpu.matmul %94, %37, %cst_36 {dimension_numbers = #tpu.dot_dimension_numbers<[1], [0], [0], [1], [0, 0, 1, 1], [], []>} : vector<8x32xf32>, vector<32x32xf32>, vector<8x32xf32> -> vector<8x32xf32>
    %96 = vector.broadcast %38 : vector<1x32xf32> to vector<8x32xf32>
    %97 = arith.addf %95, %96 : vector<8x32xf32>
    %98 = arith.addf %2, %97 : vector<8x32xf32>
    %c10 = arith.constant 10 : index
    %c0_37 = arith.constant 0 : index
    %99 = vector.load %arg6[%c10, %c0_37] : memref<16x128xf32, #tpu.memory_space<vmem>>, vector<1x32xf32>
    %c11 = arith.constant 11 : index
    %c0_38 = arith.constant 0 : index
    %100 = vector.load %arg6[%c11, %c0_38] : memref<16x128xf32, #tpu.memory_space<vmem>>, vector<1x32xf32>
    %cst_39 = arith.constant dense<0.000000e+00> : vector<8xf32>
    %101 = vector.multi_reduction <add>, %98, %cst_39 [1] : vector<8x32xf32> to vector<8xf32>
    %102 = vector.shape_cast %101 : vector<8xf32> to vector<8x1xf32>
    %cst_40 = arith.constant 3.200000e+01 : f32
    %103 = vector.broadcast %cst_40 : f32 to vector<8x1xf32>
    %104 = arith.divf %102, %103 : vector<8x1xf32>
    %105 = vector.broadcast %104 : vector<8x1xf32> to vector<8x32xf32>
    %106 = arith.subf %98, %105 : vector<8x32xf32>
    %107 = arith.mulf %106, %106 : vector<8x32xf32>
    %cst_41 = arith.constant dense<0.000000e+00> : vector<8xf32>
    %108 = vector.multi_reduction <add>, %107, %cst_41 [1] : vector<8x32xf32> to vector<8xf32>
    %109 = vector.shape_cast %108 : vector<8xf32> to vector<8x1xf32>
    %cst_42 = arith.constant 3.200000e+01 : f32
    %110 = vector.broadcast %cst_42 : f32 to vector<8x1xf32>
    %111 = arith.divf %109, %110 : vector<8x1xf32>
    %112 = vector.broadcast %104 : vector<8x1xf32> to vector<8x32xf32>
    %113 = arith.subf %98, %112 : vector<8x32xf32>
    %cst_43 = arith.constant 9.99999974E-6 : f32
    %114 = vector.broadcast %cst_43 : f32 to vector<8x1xf32>
    %115 = arith.addf %111, %114 : vector<8x1xf32>
    %116 = math.rsqrt %115 : vector<8x1xf32>
    %117 = vector.broadcast %116 : vector<8x1xf32> to vector<8x32xf32>
    %118 = arith.mulf %113, %117 : vector<8x32xf32>
    %119 = vector.broadcast %99 : vector<1x32xf32> to vector<8x32xf32>
    %120 = arith.mulf %118, %119 : vector<8x32xf32>
    %121 = vector.broadcast %100 : vector<1x32xf32> to vector<8x32xf32>
    %122 = arith.addf %120, %121 : vector<8x32xf32>
    %123 = arith.addf %5, %33 : vector<16x32xf32>
    %124 = arith.addf %122, %21 : vector<8x32xf32>
    %c144 = arith.constant 144 : index
    %c0_44 = arith.constant 0 : index
    %125 = vector.load %arg5[%c144, %c0_44] : memref<304x128xf32, #tpu.memory_space<vmem>>, vector<32x96xf32>
    %c6 = arith.constant 6 : index
    %c0_45 = arith.constant 0 : index
    %126 = vector.load %arg6[%c6, %c0_45] : memref<16x128xf32, #tpu.memory_space<vmem>>, vector<1x96xf32>
    %c176 = arith.constant 176 : index
    %c0_46 = arith.constant 0 : index
    %127 = vector.load %arg5[%c176, %c0_46] : memref<304x128xf32, #tpu.memory_space<vmem>>, vector<32x32xf32>
    %c7 = arith.constant 7 : index
    %c0_47 = arith.constant 0 : index
    %128 = vector.load %arg6[%c7, %c0_47] : memref<16x128xf32, #tpu.memory_space<vmem>>, vector<1x32xf32>
    %129 = vector.extract_strided_slice %125 {offsets = [0, 0], sizes = [32, 32], strides = [1, 1]} : vector<32x96xf32> to vector<32x32xf32>
    %cst_48 = arith.constant dense<0.000000e+00> : vector<8x32xf32>
    %130 = tpu.matmul %124, %129, %cst_48 {dimension_numbers = #tpu.dot_dimension_numbers<[1], [0], [0], [1], [0, 0, 1, 1], [], []>} : vector<8x32xf32>, vector<32x32xf32>, vector<8x32xf32> -> vector<8x32xf32>
    %131 = vector.extract_strided_slice %126 {offsets = [0, 0], sizes = [1, 32], strides = [1, 1]} : vector<1x96xf32> to vector<1x32xf32>
    %132 = vector.broadcast %131 : vector<1x32xf32> to vector<8x32xf32>
    %133 = arith.addf %130, %132 : vector<8x32xf32>
    %134 = vector.extract_strided_slice %125 {offsets = [0, 32], sizes = [32, 64], strides = [1, 1]} : vector<32x96xf32> to vector<32x64xf32>
    %cst_49 = arith.constant dense<0.000000e+00> : vector<16x64xf32>
    %135 = tpu.matmul %123, %134, %cst_49 {dimension_numbers = #tpu.dot_dimension_numbers<[1], [0], [0], [1], [0, 0, 1, 1], [], []>} : vector<16x32xf32>, vector<32x64xf32>, vector<16x64xf32> -> vector<16x64xf32>
    %136 = vector.extract_strided_slice %126 {offsets = [0, 32], sizes = [1, 64], strides = [1, 1]} : vector<1x96xf32> to vector<1x64xf32>
    %137 = vector.broadcast %136 : vector<1x64xf32> to vector<16x64xf32>
    %138 = arith.addf %135, %137 : vector<16x64xf32>
    %139 = vector.extract_strided_slice %138 {offsets = [0, 0], sizes = [16, 32], strides = [1, 1]} : vector<16x64xf32> to vector<16x32xf32>
    %140 = vector.extract_strided_slice %138 {offsets = [0, 32], sizes = [16, 32], strides = [1, 1]} : vector<16x64xf32> to vector<16x32xf32>
    %cst_50 = arith.constant 0.353553385 : f32
    %141 = vector.broadcast %cst_50 : f32 to vector<8x32xf32>
    %142 = arith.mulf %133, %141 : vector<8x32xf32>
    %143 = vector.extract_strided_slice %142 {offsets = [0, 0], sizes = [8, 8], strides = [1, 1]} : vector<8x32xf32> to vector<8x8xf32>
    %144 = vector.extract_strided_slice %142 {offsets = [0, 8], sizes = [8, 8], strides = [1, 1]} : vector<8x32xf32> to vector<8x8xf32>
    %145 = vector.extract_strided_slice %142 {offsets = [0, 16], sizes = [8, 8], strides = [1, 1]} : vector<8x32xf32> to vector<8x8xf32>
    %146 = vector.extract_strided_slice %142 {offsets = [0, 24], sizes = [8, 8], strides = [1, 1]} : vector<8x32xf32> to vector<8x8xf32>
    %147 = vector.shape_cast %143 : vector<8x8xf32> to vector<1x8x8xf32>
    %148 = vector.shape_cast %144 : vector<8x8xf32> to vector<1x8x8xf32>
    %149 = vector.shape_cast %145 : vector<8x8xf32> to vector<1x8x8xf32>
    %150 = vector.shape_cast %146 : vector<8x8xf32> to vector<1x8x8xf32>
    %151 = tpu.concatenate %147, %148, %149, %150 in 0 : vector<1x8x8xf32>, vector<1x8x8xf32>, vector<1x8x8xf32>, vector<1x8x8xf32> -> vector<4x8x8xf32>
    %152 = vector.extract_strided_slice %139 {offsets = [0, 0], sizes = [16, 8], strides = [1, 1]} : vector<16x32xf32> to vector<16x8xf32>
    %153 = vector.extract_strided_slice %139 {offsets = [0, 8], sizes = [16, 8], strides = [1, 1]} : vector<16x32xf32> to vector<16x8xf32>
    %154 = vector.extract_strided_slice %139 {offsets = [0, 16], sizes = [16, 8], strides = [1, 1]} : vector<16x32xf32> to vector<16x8xf32>
    %155 = vector.extract_strided_slice %139 {offsets = [0, 24], sizes = [16, 8], strides = [1, 1]} : vector<16x32xf32> to vector<16x8xf32>
    %156 = vector.shape_cast %152 : vector<16x8xf32> to vector<1x16x8xf32>
    %157 = vector.shape_cast %153 : vector<16x8xf32> to vector<1x16x8xf32>
    %158 = vector.shape_cast %154 : vector<16x8xf32> to vector<1x16x8xf32>
    %159 = vector.shape_cast %155 : vector<16x8xf32> to vector<1x16x8xf32>
    %160 = tpu.concatenate %156, %157, %158, %159 in 0 : vector<1x16x8xf32>, vector<1x16x8xf32>, vector<1x16x8xf32>, vector<1x16x8xf32> -> vector<4x16x8xf32>
    %161 = vector.extract_strided_slice %140 {offsets = [0, 0], sizes = [16, 8], strides = [1, 1]} : vector<16x32xf32> to vector<16x8xf32>
    %162 = vector.extract_strided_slice %140 {offsets = [0, 8], sizes = [16, 8], strides = [1, 1]} : vector<16x32xf32> to vector<16x8xf32>
    %163 = vector.extract_strided_slice %140 {offsets = [0, 16], sizes = [16, 8], strides = [1, 1]} : vector<16x32xf32> to vector<16x8xf32>
    %164 = vector.extract_strided_slice %140 {offsets = [0, 24], sizes = [16, 8], strides = [1, 1]} : vector<16x32xf32> to vector<16x8xf32>
    %165 = vector.shape_cast %161 : vector<16x8xf32> to vector<1x16x8xf32>
    %166 = vector.shape_cast %162 : vector<16x8xf32> to vector<1x16x8xf32>
    %167 = vector.shape_cast %163 : vector<16x8xf32> to vector<1x16x8xf32>
    %168 = vector.shape_cast %164 : vector<16x8xf32> to vector<1x16x8xf32>
    %169 = tpu.concatenate %165, %166, %167, %168 in 0 : vector<1x16x8xf32>, vector<1x16x8xf32>, vector<1x16x8xf32>, vector<1x16x8xf32> -> vector<4x16x8xf32>
    "tpu.trace_start"() <{level = 10 : i32, message = "hqd,hkd->hqk"}> : () -> ()
    %cst_51 = arith.constant dense<0.000000e+00> : vector<4x8x16xf32>
    %170 = tpu.matmul %151, %160, %cst_51 {dimension_numbers = #tpu.dot_dimension_numbers<[2], [2], [1], [1], [0, 0, 0, 1, 1, 1], [0], [0]>} : vector<4x8x8xf32>, vector<4x16x8xf32>, vector<4x8x16xf32> -> vector<4x8x16xf32>
    "tpu.trace_stop"() : () -> ()
    %cst_52 = arith.constant dense<0xFF800000> : vector<4x8xf32>
    %171 = vector.multi_reduction <maximumf>, %170, %cst_52 [2] : vector<4x8x16xf32> to vector<4x8xf32>
    %172 = vector.shape_cast %171 : vector<4x8xf32> to vector<4x8x1xf32>
    %173 = vector.broadcast %172 : vector<4x8x1xf32> to vector<4x8x16xf32>
    %174 = arith.subf %170, %173 : vector<4x8x16xf32>
    %175 = math.exp %174 : vector<4x8x16xf32>
    %cst_53 = arith.constant dense<0.000000e+00> : vector<4x8xf32>
    %176 = vector.multi_reduction <add>, %175, %cst_53 [2] : vector<4x8x16xf32> to vector<4x8xf32>
    %177 = vector.shape_cast %176 : vector<4x8xf32> to vector<4x8x1xf32>
    %178 = tpu.reciprocal %177 {approx = true} : vector<4x8x1xf32> -> vector<4x8x1xf32>
    %179 = vector.broadcast %178 : vector<4x8x1xf32> to vector<4x8x16xf32>
    %180 = arith.mulf %175, %179 : vector<4x8x16xf32>
    "tpu.trace_start"() <{level = 10 : i32, message = "hqk,hkd->hqd"}> : () -> ()
    %cst_54 = arith.constant dense<0.000000e+00> : vector<4x8x8xf32>
    %181 = tpu.matmul %180, %169, %cst_54 {dimension_numbers = #tpu.dot_dimension_numbers<[2], [1], [1], [2], [0, 0, 0, 1, 1, 2], [0], [0]>} : vector<4x8x16xf32>, vector<4x16x8xf32>, vector<4x8x8xf32> -> vector<4x8x8xf32>
    "tpu.trace_stop"() : () -> ()
    %182 = vector.extract_strided_slice %181 {offsets = [0, 0, 0], sizes = [1, 8, 8], strides = [1, 1, 1]} : vector<4x8x8xf32> to vector<1x8x8xf32>
    %183 = vector.shape_cast %182 : vector<1x8x8xf32> to vector<8x8xf32>
    %184 = vector.extract_strided_slice %181 {offsets = [1, 0, 0], sizes = [1, 8, 8], strides = [1, 1, 1]} : vector<4x8x8xf32> to vector<1x8x8xf32>
    %185 = vector.shape_cast %184 : vector<1x8x8xf32> to vector<8x8xf32>
    %186 = vector.extract_strided_slice %181 {offsets = [2, 0, 0], sizes = [1, 8, 8], strides = [1, 1, 1]} : vector<4x8x8xf32> to vector<1x8x8xf32>
    %187 = vector.shape_cast %186 : vector<1x8x8xf32> to vector<8x8xf32>
    %188 = vector.extract_strided_slice %181 {offsets = [3, 0, 0], sizes = [1, 8, 8], strides = [1, 1, 1]} : vector<4x8x8xf32> to vector<1x8x8xf32>
    %189 = vector.shape_cast %188 : vector<1x8x8xf32> to vector<8x8xf32>
    %190 = tpu.concatenate %183, %185, %187, %189 in 1 : vector<8x8xf32>, vector<8x8xf32>, vector<8x8xf32>, vector<8x8xf32> -> vector<8x32xf32>
    %cst_55 = arith.constant dense<0.000000e+00> : vector<8x32xf32>
    %191 = tpu.matmul %190, %127, %cst_55 {dimension_numbers = #tpu.dot_dimension_numbers<[1], [0], [0], [1], [0, 0, 1, 1], [], []>} : vector<8x32xf32>, vector<32x32xf32>, vector<8x32xf32> -> vector<8x32xf32>
    %192 = vector.broadcast %128 : vector<1x32xf32> to vector<8x32xf32>
    %193 = arith.addf %191, %192 : vector<8x32xf32>
    %194 = arith.addf %122, %193 : vector<8x32xf32>
    %c12 = arith.constant 12 : index
    %c0_56 = arith.constant 0 : index
    %195 = vector.load %arg6[%c12, %c0_56] : memref<16x128xf32, #tpu.memory_space<vmem>>, vector<1x32xf32>
    %c13 = arith.constant 13 : index
    %c0_57 = arith.constant 0 : index
    %196 = vector.load %arg6[%c13, %c0_57] : memref<16x128xf32, #tpu.memory_space<vmem>>, vector<1x32xf32>
    %cst_58 = arith.constant dense<0.000000e+00> : vector<8xf32>
    %197 = vector.multi_reduction <add>, %194, %cst_58 [1] : vector<8x32xf32> to vector<8xf32>
    %198 = vector.shape_cast %197 : vector<8xf32> to vector<8x1xf32>
    %cst_59 = arith.constant 3.200000e+01 : f32
    %199 = vector.broadcast %cst_59 : f32 to vector<8x1xf32>
    %200 = arith.divf %198, %199 : vector<8x1xf32>
    %201 = vector.broadcast %200 : vector<8x1xf32> to vector<8x32xf32>
    %202 = arith.subf %194, %201 : vector<8x32xf32>
    %203 = arith.mulf %202, %202 : vector<8x32xf32>
    %cst_60 = arith.constant dense<0.000000e+00> : vector<8xf32>
    %204 = vector.multi_reduction <add>, %203, %cst_60 [1] : vector<8x32xf32> to vector<8xf32>
    %205 = vector.shape_cast %204 : vector<8xf32> to vector<8x1xf32>
    %cst_61 = arith.constant 3.200000e+01 : f32
    %206 = vector.broadcast %cst_61 : f32 to vector<8x1xf32>
    %207 = arith.divf %205, %206 : vector<8x1xf32>
    %208 = vector.broadcast %200 : vector<8x1xf32> to vector<8x32xf32>
    %209 = arith.subf %194, %208 : vector<8x32xf32>
    %cst_62 = arith.constant 9.99999974E-6 : f32
    %210 = vector.broadcast %cst_62 : f32 to vector<8x1xf32>
    %211 = arith.addf %207, %210 : vector<8x1xf32>
    %212 = math.rsqrt %211 : vector<8x1xf32>
    %213 = vector.broadcast %212 : vector<8x1xf32> to vector<8x32xf32>
    %214 = arith.mulf %209, %213 : vector<8x32xf32>
    %215 = vector.broadcast %195 : vector<1x32xf32> to vector<8x32xf32>
    %216 = arith.mulf %214, %215 : vector<8x32xf32>
    %217 = vector.broadcast %196 : vector<1x32xf32> to vector<8x32xf32>
    %218 = arith.addf %216, %217 : vector<8x32xf32>
    %c208 = arith.constant 208 : index
    %c0_63 = arith.constant 0 : index
    %219 = vector.load %arg5[%c208, %c0_63] : memref<304x128xf32, #tpu.memory_space<vmem>>, vector<32x64xf32>
    %cst_64 = arith.constant dense<0.000000e+00> : vector<8x64xf32>
    %220 = tpu.matmul %218, %219, %cst_64 {dimension_numbers = #tpu.dot_dimension_numbers<[1], [0], [0], [1], [0, 0, 1, 1], [], []>} : vector<8x32xf32>, vector<32x64xf32>, vector<8x64xf32> -> vector<8x64xf32>
    %c8_65 = arith.constant 8 : index
    %c0_66 = arith.constant 0 : index
    %221 = vector.load %arg6[%c8_65, %c0_66] : memref<16x128xf32, #tpu.memory_space<vmem>>, vector<1x64xf32>
    %222 = vector.broadcast %221 : vector<1x64xf32> to vector<8x64xf32>
    %223 = arith.addf %220, %222 : vector<8x64xf32>
    %cst_67 = arith.constant 0.000000e+00 : f32
    %224 = vector.broadcast %cst_67 : f32 to vector<8x64xf32>
    %225 = arith.maximumf %223, %224 : vector<8x64xf32>
    %c240 = arith.constant 240 : index
    %c0_68 = arith.constant 0 : index
    %226 = vector.load %arg5[%c240, %c0_68] : memref<304x128xf32, #tpu.memory_space<vmem>>, vector<64x32xf32>
    %cst_69 = arith.constant dense<0.000000e+00> : vector<8x32xf32>
    %227 = tpu.matmul %225, %226, %cst_69 {dimension_numbers = #tpu.dot_dimension_numbers<[1], [0], [0], [1], [0, 0, 1, 1], [], []>} : vector<8x64xf32>, vector<64x32xf32>, vector<8x32xf32> -> vector<8x32xf32>
    %c9 = arith.constant 9 : index
    %c0_70 = arith.constant 0 : index
    %228 = vector.load %arg6[%c9, %c0_70] : memref<16x128xf32, #tpu.memory_space<vmem>>, vector<1x32xf32>
    %229 = vector.broadcast %228 : vector<1x32xf32> to vector<8x32xf32>
    %230 = arith.addf %227, %229 : vector<8x32xf32>
    %231 = arith.addf %218, %230 : vector<8x32xf32>
    %c14 = arith.constant 14 : index
    %c0_71 = arith.constant 0 : index
    %232 = vector.load %arg6[%c14, %c0_71] : memref<16x128xf32, #tpu.memory_space<vmem>>, vector<1x32xf32>
    %c15 = arith.constant 15 : index
    %c0_72 = arith.constant 0 : index
    %233 = vector.load %arg6[%c15, %c0_72] : memref<16x128xf32, #tpu.memory_space<vmem>>, vector<1x32xf32>
    %cst_73 = arith.constant dense<0.000000e+00> : vector<8xf32>
    %234 = vector.multi_reduction <add>, %231, %cst_73 [1] : vector<8x32xf32> to vector<8xf32>
    %235 = vector.shape_cast %234 : vector<8xf32> to vector<8x1xf32>
    %cst_74 = arith.constant 3.200000e+01 : f32
    %236 = vector.broadcast %cst_74 : f32 to vector<8x1xf32>
    %237 = arith.divf %235, %236 : vector<8x1xf32>
    %238 = vector.broadcast %237 : vector<8x1xf32> to vector<8x32xf32>
    %239 = arith.subf %231, %238 : vector<8x32xf32>
    %240 = arith.mulf %239, %239 : vector<8x32xf32>
    %cst_75 = arith.constant dense<0.000000e+00> : vector<8xf32>
    %241 = vector.multi_reduction <add>, %240, %cst_75 [1] : vector<8x32xf32> to vector<8xf32>
    %242 = vector.shape_cast %241 : vector<8xf32> to vector<8x1xf32>
    %cst_76 = arith.constant 3.200000e+01 : f32
    %243 = vector.broadcast %cst_76 : f32 to vector<8x1xf32>
    %244 = arith.divf %242, %243 : vector<8x1xf32>
    %245 = vector.broadcast %237 : vector<8x1xf32> to vector<8x32xf32>
    %246 = arith.subf %231, %245 : vector<8x32xf32>
    %cst_77 = arith.constant 9.99999974E-6 : f32
    %247 = vector.broadcast %cst_77 : f32 to vector<8x1xf32>
    %248 = arith.addf %244, %247 : vector<8x1xf32>
    %249 = math.rsqrt %248 : vector<8x1xf32>
    %250 = vector.broadcast %249 : vector<8x1xf32> to vector<8x32xf32>
    %251 = arith.mulf %246, %250 : vector<8x32xf32>
    %252 = vector.broadcast %232 : vector<1x32xf32> to vector<8x32xf32>
    %253 = arith.mulf %251, %252 : vector<8x32xf32>
    %254 = vector.broadcast %233 : vector<1x32xf32> to vector<8x32xf32>
    %255 = arith.addf %253, %254 : vector<8x32xf32>
    %256 = tpu.transpose %255, [1, 0] : vector<8x32xf32> -> vector<32x8xf32>
    %c0_78 = arith.constant 0 : index
    %c0_79 = arith.constant 0 : index
    %c0_80 = arith.constant 0 : index
    %257 = vector.load %arg7[%c0_78, %c0_79, %c0_80] : memref<1x32x8xf32, #tpu.memory_space<vmem>>, vector<1x32x8xf32>
    %258 = vector.shape_cast %257 : vector<1x32x8xf32> to vector<32x8xf32>
    %259 = vector.shape_cast %256 : vector<32x8xf32> to vector<1x32x8xf32>
    tpu.vector_store %arg7[%c0_78, %c0_79, %c0_80], %259 {strides = array<i32>} : memref<1x32x8xf32, #tpu.memory_space<vmem>>, vector<1x32x8xf32>,
    return
  }
  func.func @transform_0(%arg0: i32) -> (i32, i32, i32) {
    %c0_i32 = arith.constant 0 : i32
    %c0_i32_0 = arith.constant 0 : i32
    %c0_i32_1 = arith.constant 0 : i32
    return %arg0, %c0_i32, %c0_i32_0 : i32, i32, i32
  }
  func.func @transform_1(%arg0: i32) -> (i32, i32, i32) {
    %c0_i32 = arith.constant 0 : i32
    %c0_i32_0 = arith.constant 0 : i32
    %c0_i32_1 = arith.constant 0 : i32
    return %arg0, %c0_i32, %c0_i32_0 : i32, i32, i32
  }
  func.func @transform_2(%arg0: i32) -> (i32, i32, i32) {
    %c0_i32 = arith.constant 0 : i32
    %c0_i32_0 = arith.constant 0 : i32
    %c0_i32_1 = arith.constant 0 : i32
    return %arg0, %c0_i32, %c0_i32_0 : i32, i32, i32
  }
  func.func @transform_3(%arg0: i32) -> (i32, i32, i32) {
    %c0_i32 = arith.constant 0 : i32
    %c0_i32_0 = arith.constant 0 : i32
    %c0_i32_1 = arith.constant 0 : i32
    return %arg0, %c0_i32, %c0_i32_0 : i32, i32, i32
  }
  func.func @transform_4(%arg0: i32) -> (i32, i32) {
    %c0_i32 = arith.constant 0 : i32
    %c0_i32_0 = arith.constant 0 : i32
    %c0_i32_1 = arith.constant 0 : i32
    return %c0_i32, %c0_i32_0 : i32, i32
  }
  func.func @transform_5(%arg0: i32) -> (i32, i32) {
    %c0_i32 = arith.constant 0 : i32
    %c0_i32_0 = arith.constant 0 : i32
    %c0_i32_1 = arith.constant 0 : i32
    return %c0_i32, %c0_i32_0 : i32, i32
  }
  func.func @transform_6(%arg0: i32) -> (i32, i32, i32) {
    %c0_i32 = arith.constant 0 : i32
    %c0_i32_0 = arith.constant 0 : i32
    %c0_i32_1 = arith.constant 0 : i32
    return %arg0, %c0_i32, %c0_i32_0 : i32, i32, i32
  }
}

</mosaic_0001>

<bundles_post_ra>
// kernel: tpu_custom_call.1
= control target key start
LH: loop header
LB: loop body
LE: loop exit
PB: predicated region body
PF: predicated region fallthrough
CT: control target
= control target key end

     0   :  { %11 = vsyncpa [#allocation3], 0  ;;  %s3633_s21 = smov 0   ;;  %s3992_s0 = inlined_call_operand.vmem [shape: f32[2,32,8], index: 0, kind: input, shape index: {}]   ;;  %s3993_s1 = inlined_call_operand.vmem [shape: f32[2,32,16], index: 1, kind: input, shape index: {}]   ;;  %s3994_s2 = inlined_call_operand.vmem [shape: f32[2,8,8], index: 2, kind: input, shape index: {}]   ;;  %s3995_s3 = inlined_call_operand.vmem [shape: f32[2,16,8], index: 3, kind: input, shape index: {}]   ;;  %s3996_s4 = inlined_call_operand.hbm [shape: f32[304,128], index: 4, kind: input, shape index: {}]   ;;  %s3997_s5 = inlined_call_operand.vmem [shape: f32[16,128], index: 5, kind: input, shape index: {}]   ;;  %s3998_s6 = inlined_call_operand.vmem [shape: f32[2,32,8], index: 6, kind: output, shape index: {}]  }
   0x1 LB: > { %s3639_s22 = sadd.s32 4294967295, %s3582_s21   ;;  %p2950_p0 = scmp.ge.s32.totalorder %s3582_s21, 1  ;;  %s3582_s21 = sphi %s3633_s21, %s17_s21  }
   0x2   : > { %p194_p1 = scmp.lt.s32.totalorder %s3582_s21, 3  ;;  %s3584_s23 = smov [#allocation2]  }
   0x3   : > { %s206_s24 = sshll.u32 %s3584_s23, 4  ;;  %p3999_p3 = scmp.eq.s32.totalorder %s3639_s22, 0  ;;  %s207_s24 = int_to_ptr.vmem [resolvable:$true] %s206_s24 }
   0x4   : > { %p3643_p2 = pnand %p2950_p0, %p194_p1  ;;  %s3544_s29 = scalar_lea.hbm %s3996_s4, 4864 }
   0x5   : > { %p3545_p6 = scmp.ne.s32.totalorder %s3996_s4, %s3544_s29  ;;  %p3551_p10 = scmp.lt.u32.totalorder %s3544_s29, %s3996_s4 }
   0x6   : > { %s4001_s25 = scalar_select %p3643_p2, 1, 0 }
   0x7   : > { %p3433_p4 = pneg %p3643_p2 }
   0x9   : > { %p3652_p5 = pnand %p3999_p3, %p3433_p4 }
   0xb   : > { %p3546_p7 = pneg %p3652_p5 }
   0xd   : > { %p3547_p8 = pnand %p3546_p7, %p3545_p6 }
   0xf   : > { %p3548_p9 = pneg %p3547_p8 }
  0x11   : > { %p3553_p11 = pnand %p3551_p10, %p3548_p9 }
  0x13   : > { %3556 = shalt.err (!%p3553_p11)
}
  0x14   : > { %s3557_s10 = scalar_lea.vmem %s207_s24, 4864  ;;  %p3565_p1 = scmp.lt.s32.totalorder %s207_s24, %s207_s24 }
  0x15   : > { %p3558_p12 = scmp.ne.s32.totalorder %s207_s24, %s3557_s10  ;;  %p3566_p4 = scmp.lt.s32.totalorder %s3557_s10, %s3557_s10 }
  0x17   : > { %p3560_p13 = pnand %p3558_p12, %p3546_p7  ;;  %p3567_p3 = por %p3566_p4, %p3565_p1 }
  0x19   : > { %p3561_p0 = pneg %p3560_p13 }
  0x1b   : > { %p3568_p2 = pnand %p3567_p3, %p3561_p0 }
  0x1d   : > { %3571 = shalt.err (!%p3568_p2)
}
  0x1e   : > { %s3585_s11 = smov 128   ;;  %s3586_s12 = smov 8  }
  0x1f   : > { %3436 = dma.hbm_to_vmem [thread:$0]  (!%p3652_p5), %s3996_s4, 4864, %s207_s24, [#allocation3], %s3585_s11, %s3585_s11, %s3586_s12  }
  0x20   : > { %p4003_p6 = scmp.ne.s32.totalorder %s4001_s25, 0 }
  0x21   : > { %p4004_p8 = scmp.eq.s32.totalorder (!%p4003_p6), %s3639_s22, 0 }
  0x22   : > { %256 = sbr.rel (%p4003_p6) target bundleno = 4984 (0x1378), region = 44 }
  0x29   : > { %3577 = dma.done.wait (%p4004_p8), [#allocation3], 4864   ;;  %p4005_p7 = pmov %p4004_p8 }
  0x2a   : > { %p300_p2 = scmp.lt.s32.totalorder %s3639_s22, 1  ;;  %v3587_v0 = vmov 0.0   ;;  %vm3588_vm0 = vmmov 0   ;;  %v3589_v1 = vmov 0.0|0.0   ;;  %vm410_vm1 = vcmask 64512   ;;  %v399_v2 = vld [vmem:[#allocation2] sm:$0xff] }
  0x2b   : > { %3579 = vsyncadd (%p4005_p7), [#allocation3], 4294962432  ;;  %3124 = vmatprep.subr.mxu0 %v3587_v0  ;;  %3126 = vmatprep.mubr.msk.f32.mxu0 %vm3588_vm0, %v3587_v0  ;;  %v563_v4 = vld [vmem:[#allocation2 + $0x28] sm:$0xff]  ;;  %v402_v7 = vld [vmem:[#allocation2 + $0x10] sm:$0xff]  ;;  %vm489_vm2 = vcmask 261120   ;;  %s3590_s14 = smov 120  }
  0x2c   : > { %s4009_s22 = smov (!%p300_p2, %s3639_s22), 1  ;;  %3337 = vmatprep.subr.bf16.mxu1 %v3589_v1  ;;  %3137 = vmatprep.mubr.msk.f32.mxu1 %vm3588_vm0, %v3587_v0  ;;  %v401_v6 = vld [vmem:[#allocation2 + $0x8] sm:$0xff]  ;;  %v403_v10 = vld [vmem:[#allocation2 + $0x18] sm:$0xff]  ;;  %v404_v11 = vld [vmem:[#allocation2 + $0x20] sm:$0xff]  ;;  %s3593_s17 = smov 96   ;;  %vm1510_vm3 = vcmask 130048  }
  0x2d   : > { %s2959_s15 = sshll.u32 %s4009_s22, 3  ;;  %s3026_s16 = sshll.u32 %s4009_s22, 4  ;;  %3125 = vmatpush3.msra.mxu0 %v399_v2  ;;  %v3338_v9 = vpack.c.bf16 %v402_v7, %v401_v6  ;;  %v3341_v12 = vpack.c.bf16 %v404_v11, %v403_v10  ;;  %v565_v13 = vld [vmem:[#allocation2 + $0x30] sm:$0xff]  ;;  %v566_v14 = vld [vmem:[#allocation2 + $0x38] sm:$0xff]  ;;  %v2964_v20 = vld [vmem:[%s3997_s5] ss:$0 sm:$0xff] }
  0x2e   : > { %s313_s19 = scalar_lea.vmem %s3994_s2, %s2959_s15  ;;  %s318_s24 = scalar_lea.vmem %s3995_s3, %s3026_s16  ;;  %3140 = vmatprep.subr.mxu0 %v563_v4  ;;  %v3343_v15 = vpack.c.bf16 %v566_v14, %v565_v13  ;;  %v567_v22 = vld [vmem:[#allocation2 + $0x40] sm:$0xff]  ;;  %v568_v23 = vld [vmem:[#allocation2 + $0x48] sm:$0xff]  ;;  %v743_v33 = vld [vmem:[#allocation2 + $0x50] sm:$0xff]  ;;  %vm1512_vm4 = vcmask 195584   ;;  %vm2709_vm6 = vcmask 523264  }
  0x2f   : > { %v396_v3 = vld [vmem:[%s313_s19] sm:$0xff]  ;;  %v398_v8 = vld [vmem:[%s318_s24 + $0x8] sm:$0xff]  ;;  %3339 = vmatpush3.bf16.msra.mxu1 %v3338_v9  ;;  %s3704_s25 = sshll.u32 %s4009_s22, 5  ;;  %v3347_v28 = vpack.c.bf16 %v568_v23, %v567_v22  ;;  %v744_v34 = vld [vmem:[#allocation2 + $0x58] sm:$0xff]  ;;  %s3591_s15 = smov 112  }
  0x30   : > { %v397_v5 = vld [vmem:[%s318_s24] sm:$0xff]  ;;  %3127 = vmatmul.mubr.msk.f32.vlgmr.msra.gmra.mrb[0].mxu0 %vm410_vm1, %v396_v3  ;;  %3340 = vmatprep.subr.bf16.mxu1 %v3589_v1  ;;  %s304_s28 = scalar_lea.vmem %s3992_s0, %s3704_s25  ;;  %v3352_v37 = vpack.c.bf16 %v744_v34, %v743_v33  ;;  %v746_v39 = vld [vmem:[#allocation2 + $0x68] sm:$0xff]  ;;  %s3592_s16 = smov 104   ;;  %vm3872_vm5 = vmpackc.low %vm410_vm1, %vm410_vm1 }
  0x31   : > { %3141 = vmatpush3.msra.mxu0 %v563_v4  ;;  %3142 = vmatprep.mubr.msk.f32.mxu0 %vm410_vm1, %v397_v5  ;;  %v324_v16 = vld [vmem:[%s304_s28] sm:$0xff]  ;;  %v325_v17 = vld [vmem:[%s304_s28 + $0x8] sm:$0xff]  ;;  %v326_v18 = vld [vmem:[%s304_s28 + $0x10] sm:$0xff]  ;;  %s3594_s18 = smov 64   ;;  %s3595_s19 = smov 8  }
  0x32   : > { %3167 = vmatprep.subr.mxu0 %v3587_v0  ;;  %328 = vxpose.xlu0.b32.start [1/4] (short) (narrow) %v324_v16, 8  ;;  %v327_v19 = vld [vmem:[%s304_s28 + $0x18] sm:$0xff]  ;;  %v2968_v26 = vld [vmem:[%s3997_s5 + $0x2] ss:$0 sm:$0xff]  ;;  %v2966_v41 = vld [vmem:[%s3997_s5 + $0x1] ss:$0 sm:$0xff]  ;;  %s309_s29 = scalar_lea.vmem %s3993_s1, %s3704_s25  ;;  %s323_s22 = scalar_lea.vmem %s3998_s6, %s3704_s25 }
  0x33   : > { %3342 = vmatpush3.bf16.msra.mxu1 %v3341_v12  ;;  %v745_v38 = vld [vmem:[#allocation2 + $0x60] sm:$0xff]  ;;  %s3596_s20 = smov 16   ;;  %s3597_s23 = smov 24  }
  0x34   : > { %3143 = vmatmul.mubr.msk.f32.vlgmr.msra.gmra.mrb[2].mxu0 %vm410_vm1, %v398_v8  ;;  %3344 = vmatprep.subr.bf16.mxu1 %v3343_v15  ;;  %v3355_v40 = vpack.c.bf16 %v746_v39, %v745_v38  ;;  %v3737_v47 = vld [vmem:[%s3997_s5 + $0x3] ss:$0 sm:$0xff]  ;;  %v2974_v51 = vld [vmem:[%s3997_s5 + $0x4] ss:$0 sm:$0xff] }
  0x35   : > { %3169 = vmatprep.mubr.msk.f32.mxu0 %vm3588_vm0, %v3587_v0 }
  0x36   : > { %329 = vxpose.xlu0.b32.cont [2/4] (short) (narrow) %v325_v17, 8 }
  0x3a   : > { %330 = vxpose.xlu0.b32.cont [3/4] (short) (narrow) %v326_v18, 8 }
  0x3e   : > { %331 = vxpose.xlu0.b32.end [4/4] (short) (narrow) %v327_v19, 8 }
  0xb2   : > { %v3727_v43 = vpop.trf.xlu0 }
 0x103   : > { %v480_v21 = vpop.f32.mrb[0].mxu0 }
 0x104   : > { %v481_v24 = vadd.f32 %v2964_v20, %v480_v21  ;;  %v3128_v25 = vpop.f32.mrb[1].mxu0 }
 0x106   : > { %v484_v27 = vmax.f32 %v481_v24, 0.0 }
 0x107   : > { %v3144_v29 = vpop.f32.mrb[2].mxu0 }
 0x108   : > { %3138 = vmatmul.mubr.msk.f32.vlgmr.msra.gmra.mrb[0].mxu1 %vm489_vm2, %v484_v27  ;;  %v652_v30 = vadd.f32 %v3144_v29, %v2968_v26  ;;  %v646_v31 = vpop.f32.mrb[3].mxu0 }
 0x109   : > { %3346 = vmatpush3.bf16.msra.mxu1 %v3343_v15  ;;  %v647_v32 = vadd.f32 %v2968_v26, %v646_v31 }
 0x10a   : > { %3348 = vmatprep.subr.bf16.mxu1 %v3347_v28  ;;  %v656_v36 = vmax.f32 %v652_v30, 0.0 }
 0x10b   : > { %v655_v35 = vmax.f32 %v647_v32, 0.0 }
 0x10d   : > { %3350 = vmatpush3.bf16.msra.mxu1 %v3347_v28  ;;  %3153 = vmatprep.mubr.msk.f32.mxu1 %vm489_vm2, %v655_v35 }
 0x10e   : > { %3351 = vmatprep.subr.bf16.mxu1 %v3589_v1 }
 0x110   : > { %3154 = vmatmul.mubr.msk.f32.vlgmr.msra.gmra.mrb[2].mxu1 %vm489_vm2, %v656_v36 }
 0x111   : > { %3353 = vmatpush3.bf16.msra.mxu1 %v3352_v37  ;;  %3164 = vmatprep.mubr.msk.f32.mxu1 %vm3588_vm0, %v3587_v0 }
 0x112   : > { %3354 = vmatprep.subr.bf16.mxu1 %v3589_v1 }
 0x115   : > { %3356 = vmatpush3.bf16.msra.mxu1 %v3355_v40 }
 0x116   : > { %3172 = vmatprep.subr.mxu1 %v3587_v0 }
 0x1db   : > { %v559_v42 = vpop.f32.mrb[0].mxu1 }
 0x1dc   : > { %v3729_v44 = vadd.f32 %v2966_v41, %v559_v42  ;;  %v3139_v45 = vpop.f32.mrb[1].mxu1 }
 0x1de   : > { %v742_v46 = vadd.f32 %v3729_v44, %v3727_v43 }
 0x1e0   : > { %3165 = vmatmul.mubr.msk.f32.vlgmr.msra.gmra.mrb[4].mxu1 %vm489_vm2, %v742_v46 }
 0x1e1   : > { %3174 = vmatprep.mubr.msk.f32.mxu1 %vm3588_vm0, %v3587_v0 }
 0x1e3   : > { %v3155_v48 = vpop.f32.mrb[2].mxu1 }
 0x1e4   : > { %v3742_v49 = vadd.f32 %v3155_v48, %v3737_v47  ;;  %v3744_v50 = vpop.f32.mrb[3].mxu1 }
 0x2b3   : > { %v826_v52 = vpop.f32.mrb[4].mxu1 }
 0x2b4   : > { %v3749_v53 = vadd.f32 %v2974_v51, %v826_v52  ;;  %v3166_v54 = vpop.f32.mrb[5].mxu1 }
 0x2b6   : > { %839 = vrot.lane.b32.xlu1 %v3749_v53, %s3590_s14  ;;  %v830_v55 = vmul.f32 0.35355338, %v3749_v53 }
 0x2ba   : > { %841 = vrot.lane.b32.xlu1 %v3749_v53, %s3591_s15 }
 0x2be   : > { %843 = vrot.lane.b32.xlu1 %v3749_v53, %s3592_s16 }
 0x2c2   : > { %845 = vrot.lane.b32.xlu1 %v3749_v53, %s3593_s17 }
 0x2c6   : > { %832 = vrot.lane.b32.xlu1 %v830_v55, %s3590_s14 }
 0x2ca   : > { %834 = vrot.lane.b32.xlu1 %v830_v55, %s3591_s15 }
 0x328   : > { %v3762_v56 = vpop.permute.xlu1 %839 }
 0x329   : > { %921 = vrot.lane.b32.xlu0 %v3762_v56, %s3593_s17 }
 0x32c   : > { %v3766_v57 = vpop.permute.xlu1 %841 }
 0x32d   : > { %997 = vrot.lane.b32.xlu1 %v3766_v57, %s3593_s17 }
 0x330   : > { %v3770_v58 = vpop.permute.xlu1 %843 }
 0x331   : > { %1073 = vrot.lane.b32.xlu1 %v3770_v58, %s3593_s17 }
 0x334   : > { %v846_v59 = vpop.permute.xlu1 %845 }
 0x335   : > { %3168 = vmatpush3.xpose.msk.msra.mxu0 %vm410_vm1, %v846_v59  ;;  %836 = vrot.lane.b32.xlu1 %v830_v55, %s3592_s16  ;;  %v750_v59 = vld [vmem:[#allocation2 + $0x80] sm:$0xff] }
 0x336   : > { %3177 = vmatprep.subr.mxu0 %v3587_v0 }
 0x338   : > { %3170 = vmatmul.mubr.msk.f32.vlgmr.msra.gmra.mrb[4].mxu0 %vm410_vm1, %v830_v55  ;;  %v833_v60 = vpop.permute.xlu1 %832 }
 0x339   : > { %3179 = vmatprep.mubr.msk.f32.mxu0 %vm3588_vm0, %v3587_v0 }
 0x33c   : > { %v835_v61 = vpop.permute.xlu1 %834 }
 0x39b   : > { %v922_v62 = vpop.permute.xlu0 %921 }
 0x39c   : > { %3173 = vmatpush3.xpose.msk.msra.mxu1 %vm410_vm1, %v922_v62 }
 0x39d   : > { %3182 = vmatprep.subr.mxu1 %v3587_v0 }
 0x39f   : > { %3175 = vmatmul.mubr.msk.f32.vlgmr.msra.gmra.mrb[6].mxu1 %vm410_vm1, %v833_v60  ;;  %v998_v63 = vpop.permute.xlu1 %997 }
 0x3a0   : > { %3178 = vmatpush3.xpose.msk.msra.mxu0 %vm410_vm1, %v998_v63  ;;  %3184 = vmatprep.mubr.msk.f32.mxu1 %vm3588_vm0, %v3587_v0 }
 0x3a1   : > { %3187 = vmatprep.subr.mxu0 %v3587_v0 }
 0x3a3   : > { %v1074_v2 = vpop.permute.xlu1 %1073  ;;  %3180 = vmatmul.mubr.msk.f32.vlgmr.msra.gmra.mrb[6].mxu0 %vm410_vm1, %v835_v61  ;;  %v751_v61 = vld [vmem:[#allocation2 + $0x88] sm:$0xff] }
 0x3a4   : > { %3183 = vmatpush3.xpose.msk.msra.mxu1 %vm410_vm1, %v1074_v2  ;;  %3189 = vmatprep.mubr.msk.f32.mxu0 %vm3588_vm0, %v3587_v0  ;;  %v3361_v62 = vpack.c.bf16 %v751_v61, %v750_v59 }
 0x3a5   : > { %3192 = vmatprep.subr.mxu1 %v3587_v0 }
 0x3a7   : > { %v837_v3 = vpop.permute.xlu1 %836 }
 0x3a8   : > { %3185 = vmatmul.mubr.msk.f32.vlgmr.msra.gmra.mrb[8].mxu1 %vm410_vm1, %v837_v3 }
 0x3a9   : > { %3194 = vmatprep.mubr.msk.f32.mxu1 %vm3588_vm0, %v3587_v0 }
 0x40b   : > { %v917_v4 = vpop.f32.mrb[4].mxu0 }
 0x40c   : > { %v3171_v5 = vpop.f32.mrb[5].mxu0  ;;  %v1149_v6 = vsel %vm410_vm1, %v917_v4, -inf }
 0x40d   : > { %1150 = vmax.xlane.f32.xlu1 %v1149_v6 }
 0x472   : > { %v993_v7 = vpop.f32.mrb[6].mxu1 }
 0x473   : > { %v3176_v8 = vpop.f32.mrb[7].mxu1  ;;  %v1152_v9 = vsel %vm410_vm1, %v993_v7, -inf }
 0x474   : > { %1153 = vmax.xlane.f32.xlu0 %v1152_v9 }
 0x476   : > { %v1069_v10 = vpop.f32.mrb[6].mxu0 }
 0x477   : > { %v3181_v11 = vpop.f32.mrb[7].mxu0  ;;  %v1155_v12 = vsel %vm410_vm1, %v1069_v10, -inf }
 0x478   : > { %1156 = vmax.xlane.f32.xlu1 %v1155_v12 }
 0x47b   : > { %v1145_v13 = vpop.f32.mrb[8].mxu1 }
 0x47c   : > { %v3186_v14 = vpop.f32.mrb[9].mxu1  ;;  %v1158_v15 = vsel %vm410_vm1, %v1145_v13, -inf }
 0x47d   : > { %1159 = vmax.xlane.f32.xlu1 %v1158_v15  ;;  %v2988_v15 = vld [vmem:[%s3997_s5 + $0x5] ss:$0 sm:$0xff] }
 0x49a   : > { %v1151_v16 = vpop.xlane.xlu1 %1150 }
 0x49b   : > { %v1161_v17 = vsub.f32 %v917_v4, %v1151_v16 }
 0x49d   : > { %v1165_v18 = vmul.f32 1.442695, %v1161_v17 }
 0x49f   : > { %3506 = vpow2.f32 %v1165_v18 }
 0x4a9   : > { %v3507_v19 = vpop.eup %3506 }
 0x4aa   : > { %v1173_v20 = vsel %vm410_vm1, %v3507_v19, 0.0 }
 0x4ab   : > { %1174 = vadd.xlane.f32.xlu1 %v1173_v20 }
 0x501   : > { %v1154_v21 = vpop.xlane.xlu0 %1153 }
 0x502   : > { %v1162_v22 = vsub.f32 %v993_v7, %v1154_v21  ;;  %v1623_v21 = vld [vmem:[#allocation2 + $0xa0] sm:$0xff] }
 0x504   : > { %v1167_v23 = vmul.f32 1.442695, %v1162_v22  ;;  %v1624_v22 = vld [vmem:[#allocation2 + $0xa8] sm:$0xff] }
 0x505   : > { %v1157_v24 = vpop.xlane.xlu1 %1156 }
 0x506   : > { %3508 = vpow2.f32 %v1167_v23  ;;  %v1163_v25 = vsub.f32 %v1069_v10, %v1157_v24  ;;  %v3466_v23 = vpack.i.bf16 %v1624_v22, %v1623_v21  ;;  %v1621_v24 = vld [vmem:[#allocation2 + $0x90] sm:$0xff] }
 0x508   : > { %v1169_v26 = vmul.f32 1.442695, %v1163_v25  ;;  %v1622_v25 = vld [vmem:[#allocation2 + $0x98] sm:$0xff] }
 0x50a   : > { %3510 = vpow2.f32 %v1169_v26  ;;  %v1160_v31 = vpop.xlane.xlu1 %1159  ;;  %v3461_v26 = vpack.i.bf16 %v1622_v25, %v1621_v24 }
 0x50b   : > { %v1164_v32 = vsub.f32 %v1145_v13, %v1160_v31  ;;  %v363_v31 = vld [vmem:[%s309_s29 + $0x18] sm:$0xff] }
 0x50d   : > { %v1171_v33 = vmul.f32 1.442695, %v1164_v32 }
 0x50f   : > { %3512 = vpow2.f32 %v1171_v33 }
 0x510   : > { %v3509_v27 = vpop.eup %3508 }
 0x511   : > { %v1176_v28 = vsel %vm410_vm1, %v3509_v27, 0.0 }
 0x512   : > { %1177 = vadd.xlane.f32.xlu1 %v1176_v28  ;;  %v3367_v28 = vpack.c.bf16 %v1624_v22, %v1623_v21 }
 0x514   : > { %v3511_v29 = vpop.eup %3510 }
 0x515   : > { %v1179_v30 = vsel %vm410_vm1, %v3511_v29, 0.0 }
 0x516   : > { %1180 = vadd.xlane.f32.xlu0 %v1179_v30  ;;  %v362_v30 = vld [vmem:[%s309_s29 + $0x10] sm:$0xff] }
 0x519   : > { %v3513_v34 = vpop.eup %3512 }
 0x51a   : > { %v1182_v35 = vsel %vm410_vm1, %v3513_v34, 0.0 }
 0x523   : > { %1269 = vrot.lane.b32.xlu1 %v3762_v56, %s3594_s18 }
 0x527   : > { %1345 = vrot.lane.b32.xlu1 %v3766_v57, %s3594_s18  ;;  %v748_v57 = vld [vmem:[#allocation2 + $0x70] sm:$0xff] }
 0x52c   : > { %1193 = vrot.lane.b32.xlu0 %v3749_v53, %s3594_s18 }
 0x538   : > { %v1175_v36 = vpop.xlane.xlu1 %1174 }
 0x539   : > { %3514 = vrcp.f32 %v1175_v36 }
 0x543   : > { %v3515_v40 = vpop.eup %3514 }
 0x544   : > { %v1189_v41 = vmul.f32 %v3515_v40, %v3507_v19  ;;  %v2992_v40 = vld [vmem:[%s3997_s5 + $0x6] ss:$0 sm:$0xff] }
 0x54b   : > { %1183 = vadd.xlane.f32.xlu1 %v1182_v35 }
 0x55c   : > { %1421 = vrot.lane.b32.xlu1 %v3770_v58, %s3594_s18  ;;  %v749_v58 = vld [vmem:[#allocation2 + $0x78] sm:$0xff] }
 0x55d   : > { %v3358_v60 = vpack.c.bf16 %v749_v58, %v748_v57  ;;  %v2990_v58 = vld [vmem:[%s3997_s5 + $0xa] ss:$0 sm:$0xff] }
 0x59f   : > { %v1178_v37 = vpop.xlane.xlu1 %1177 }
 0x5a0   : > { %3516 = vrcp.f32 %v1178_v37 }
 0x5a3   : > { %v1181_v38 = vpop.xlane.xlu0 %1180  ;;  %v1270_v39 = vpop.permute.xlu1 %1269 }
 0x5a4   : > { %3518 = vrcp.f32 %v1181_v38  ;;  %3193 = vmatpush3.msra.mxu1 %v1270_v39  ;;  %v734_v38 = vadd.f32 %v3737_v47, %v3744_v50 }
 0x5a5   : > { %3202 = vmatprep.subr.mxu1 %v3587_v0 }
 0x5a7   : > { %v1194_v42 = vpop.permute.xlu0 %1193  ;;  %v1346_v45 = vpop.permute.xlu1 %1345 }
 0x5a8   : > { %3188 = vmatpush3.msra.mxu0 %v1194_v42 }
 0x5a9   : > { %3190 = vmatmul.mubr.msk.f32.vlgmr.msra.gmra.mrb[8].mxu0 %vm410_vm1, %v1189_v41  ;;  %3197 = vmatprep.subr.mxu0 %v3587_v0 }
 0x5aa   : > { %v3517_v46 = vpop.eup %3516  ;;  %3198 = vmatpush3.msra.mxu0 %v1346_v45  ;;  %3199 = vmatprep.mubr.msk.f32.mxu0 %vm3588_vm0, %v3587_v0 }
 0x5ab   : > { %v1190_v48 = vmul.f32 %v3517_v46, %v3509_v27  ;;  %3357 = vmatprep.subr.bf16.mxu0 %v3589_v1  ;;  %v3364_v27 = vpack.c.bf16 %v1622_v25, %v1621_v24 }
 0x5ad   : > { %3195 = vmatmul.mubr.msk.f32.vlgmr.msra.gmra.mrb[10].mxu1 %vm410_vm1, %v1190_v48 }
 0x5ae   : > { %v3519_v51 = vpop.eup %3518  ;;  %3204 = vmatprep.mubr.msk.f32.mxu1 %vm3588_vm0, %v3587_v0 }
 0x5af   : > { %v1191_v52 = vmul.f32 %v3519_v51, %v3511_v29  ;;  %v361_v29 = vld [vmem:[%s309_s29 + $0x8] sm:$0xff] }
 0x5b1   : > { %3200 = vmatmul.mubr.msk.f32.vlgmr.msra.gmra.mrb[10].mxu0 %vm410_vm1, %v1191_v52 }
 0x5b2   : > { %3215 = vmatprep.mubr.msk.f32.mxu0 %vm3588_vm0, %v3587_v0  ;;  %3359 = vmatpush3.bf16.msra.mxu0 %v3358_v60  ;;  %v2991_v60 = vld [vmem:[%s3997_s5 + $0xb] ss:$0 sm:$0xff] }
 0x5b3   : > { %3360 = vmatprep.subr.bf16.mxu0 %v3589_v1 }
 0x5b6   : > { %3362 = vmatpush3.bf16.msra.mxu0 %v3361_v62 }
 0x5d8   : > { %v1184_v53 = vpop.xlane.xlu1 %1183 }
 0x5d9   : > { %3520 = vrcp.f32 %v1184_v53 }
 0x5dc   : > { %v1422_v54 = vpop.permute.xlu1 %1421 }
 0x5dd   : > { %3203 = vmatpush3.msra.mxu1 %v1422_v54 }
 0x5de   : > { %3363 = vmatprep.subr.bf16.mxu1 %v3589_v1 }
 0x5e3   : > { %v3521_v55 = vpop.eup %3520 }
 0x5e4   : > { %v1192_v56 = vmul.f32 %v3521_v55, %v3513_v34 }
 0x5e6   : > { %3205 = vmatmul.mubr.msk.f32.vlgmr.msra.gmra.mrb[12].mxu1 %vm410_vm1, %v1192_v56 }
 0x5e7   : > { %3226 = vmatprep.mubr.msk.f32.mxu1 %vm3588_vm0, %v3587_v0  ;;  %3365 = vmatpush3.bf16.msra.mxu1 %v3364_v27 }
 0x5e8   : > { %3366 = vmatprep.subr.bf16.mxu1 %v3589_v1 }
 0x5eb   : > { %3368 = vmatpush3.bf16.msra.mxu1 %v3367_v28 }
 0x5ec   : > { %3377 = vmatprep.subr.bf16.mxu1 %v3589_v1 }
 0x67c   : > { %v1265_v63 = vpop.f32.mrb[8].mxu0 }
 0x67d   : > { %v3191_v2 = vpop.f32.mrb[9].mxu0 }
 0x680   : > { %v1341_v3 = vpop.f32.mrb[10].mxu1 }
 0x681   : > { %1498 = vrot.lane.b32.xlu0 %v1341_v3, %s3595_s19  ;;  %v3196_v4 = vpop.f32.mrb[11].mxu1 }
 0x684   : > { %v1417_v5 = vpop.f32.mrb[10].mxu0 }
 0x685   : > { %1502 = vrot.lane.b32.xlu1 %v1417_v5, %s3596_s20  ;;  %v3201_v6 = vpop.f32.mrb[11].mxu0 }
 0x6b9   : > { %v1493_v7 = vpop.f32.mrb[12].mxu1 }
 0x6ba   : > { %1506 = vrot.lane.b32.xlu0 %v1493_v7, %s3597_s23  ;;  %v3206_v8 = vpop.f32.mrb[13].mxu1 }
 0x6f3   : > { %v1499_v9 = vpop.permute.xlu0 %1498 }
 0x6f4   : > { %v1509_v11 = vsel %vm410_vm1, %v1265_v63, %v1499_v9 }
 0x6f7   : > { %v1503_v10 = vpop.permute.xlu1 %1502 }
 0x6f8   : > { %v1511_v12 = vsel %vm1510_vm3, %v1509_v11, %v1503_v10 }
 0x72c   : > { %v1507_v13 = vpop.permute.xlu0 %1506 }
 0x72d   : > { %v1513_v14 = vsel %vm1512_vm4, %v1511_v12, %v1507_v13 }
 0x72e   : > { %3216 = vmatmul.mubr.msk.f32.vlgmr.msra.gmra.mrb[12].mxu0 %vm489_vm2, %v1513_v14 }
 0x801   : > { %v1587_v16 = vpop.f32.mrb[12].mxu0 }
 0x802   : > { %v1588_v17 = vadd.f32 %v2988_v15, %v1587_v16  ;;  %v3217_v18 = vpop.f32.mrb[13].mxu0 }
 0x804   : > { %v1591_v19 = vadd.f32 %v1588_v17, %v3727_v43  ;;  %v360_v43 = vld [vmem:[%s309_s29] sm:$0xff] }
 0x806   : > { %v1594_v20 = vsel %vm489_vm2, %v1591_v19, 0.0 }
 0x807   : > { %1595 = vadd.xlane.f32.xlu1 %v1594_v20 }
 0x818   : > { %3467 = vrot.lane.b32.xlu1 %v3466_v23, %s3593_s17 }
 0x841   : > { %364 = vxpose.xlu1.b32.start [1/4] (short) (narrow) %v360_v43, 16 }
 0x845   : > { %365 = vxpose.xlu1.b32.cont [2/4] (short) (narrow) %v361_v29, 16 }
 0x849   : > { %366 = vxpose.xlu1.b32.cont [3/4] (short) (narrow) %v362_v30, 16 }
 0x84d   : > { %367 = vxpose.xlu1.b32.end [4/4] (short) (narrow) %v363_v31, 16 }
 0x894   : > { %v1596_v32 = vpop.xlane.xlu1 %1595 }
 0x895   : > { %v1598_v33 = vmul.f32 0.03125, %v1596_v32 }
 0x897   : > { %v1599_v34 = vsub.f32 %v1591_v19, %v1598_v33 }
 0x898   : > { %v3468_v37 = vpop.permute.xlu1 %3467 }
 0x899   : > { %v1600_v35 = vmul.f32 %v1599_v34, %v1599_v34  ;;  %v3470_v48 = vunpack.i.h.bf16 %v3468_v37  ;;  %v3469_v52 = vunpack.i.l.bf16 %v3468_v37 }
 0x89b   : > { %v1601_v36 = vsel %vm489_vm2, %v1600_v35, 0.0  ;;  %v3373_v50 = vpack.c.bf16 %v3470_v48, %v3469_v52 }
 0x89c   : > { %1602 = vadd.xlane.f32.xlu0 %v1601_v36 }
 0x8b2   : > { %3462 = vrot.lane.b32.xlu0 %v3461_v26, %s3593_s17 }
 0x8b6   : > { %1725 = vrot.lane.b32.xlu0 %v2992_v40, %s3593_s17 }
 0x8c1   : > { %v380_v39 = vpop.trf.xlu1 }
 0x8c2   : > { %v1618_v41 = vadd.f32 %v734_v38, %v380_v39 }
 0x8c4   : > { %3237 = vmatprep.mubr.msk.f32.mxu0 %vm489_vm2, %v1618_v41 }
 0x8c5   : > { %v381_v55 = vpop.trf.xlu1 }
 0x8c6   : > { %v1619_v57 = vadd.f32 %v3742_v49, %v381_v55 }
 0x929   : > { %v1603_v42 = vpop.xlane.xlu0 %1602 }
 0x92a   : > { %v1604_v45 = vmul.f32 0.03125, %v1603_v42 }
 0x92c   : > { %v1605_v46 = vadd.f32 1e-05, %v1604_v45 }
 0x92d   : > { %v3463_v51 = vpop.permute.xlu0 %3462 }
 0x92e   : > { %3522 = vrsqrt.f32 %v1605_v46  ;;  %v3465_v53 = vunpack.i.h.bf16 %v3463_v51  ;;  %v3464_v54 = vunpack.i.l.bf16 %v3463_v51 }
 0x930   : > { %v3369_v47 = vpack.c.bf16 %v3465_v53, %v3464_v54 }
 0x931   : > { %v1726_v63 = vpop.permute.xlu0 %1725 }
 0x932   : > { %3370 = vmatprep.subr.bf16.mxu0 %v3369_v47 }
 0x933   : > { %3372 = vmatpush3.bf16.msra.mxu0 %v3369_v47 }
 0x934   : > { %3374 = vmatprep.subr.bf16.mxu0 %v3373_v50 }
 0x937   : > { %3376 = vmatpush3.bf16.msra.mxu0 %v3373_v50 }
 0x938   : > { %v3523_v56 = vpop.eup %3522  ;;  %3381 = vmatprep.subr.bf16.mxu0 %v3589_v1 }
 0x939   : > { %v1607_v59 = vmul.f32 %v3523_v56, %v1599_v34 }
 0x93a   : > { %3238 = vmatmul.mubr.msk.f32.vlgmr.msra.gmra.mrb[14].mxu0 %vm489_vm2, %v1619_v57 }
 0x93b   : > { %v1612_v61 = vmul.f32 %v2990_v58, %v1607_v59  ;;  %3251 = vmatprep.mubr.msk.f32.mxu0 %vm3588_vm0, %v3587_v0 }
 0x93d   : > { %v3863_v62 = vadd.f32 %v2991_v60, %v1612_v61 }
 0x93f   : > { %v1620_v49 = vadd.f32 %v3863_v62, %v3729_v44 }
 0x941   : > { %3227 = vmatmul.mubr.msk.f32.vlgmr.msra.gmra.mrb[14].mxu1 %vm489_vm2, %v1620_v49 }
 0x942   : > { %3244 = vmatprep.mubr.msk.f32.mxu1 %vm3588_vm0, %v3587_v0 }
 0xa0d   : > { %v3239_v2 = vpop.f32.mrb[14].mxu0 }
 0xa0e   : > { %v1806_v3 = vadd.f32 %v3239_v2, %v1726_v63  ;;  %v1800_v4 = vpop.f32.mrb[15].mxu0 }
 0xa0f   : > { %v1801_v5 = vadd.f32 %v1800_v4, %v1726_v63 }
 0xa11   : > { %v3471_v7 = vpack.i.bf16 %v1806_v3, %v1801_v5  ;;  %v3378_v8 = vpack.c.bf16 %v1806_v3, %v1801_v5 }
 0xa13   : > { %3472 = vrot.lane.b32.xlu0 %v3471_v7, %s3590_s14  ;;  %3380 = vmatpush3.bf16.xpose.msk.msra.mxu1 %vm3872_vm5, %v3378_v8 }
 0xa14   : > { %v1704_v44 = vpop.f32.mrb[14].mxu1  ;;  %3385 = vmatprep.subr.bf16.mxu1 %v3589_v1 }
 0xa15   : > { %v1705_v9 = vadd.f32 %v2992_v40, %v1704_v44  ;;  %v3228_v10 = vpop.f32.mrb[15].mxu1 }
 0xa17   : > { %v1809_v11 = vmul.f32 0.35355338, %v1705_v9  ;;  %3477 = vrot.lane.b32.xlu0 %v3471_v7, %s3591_s15 }
 0xa1a   : > { %3245 = vmatmul.mubr.msk.f32.vlgmr.msra.gmra.mrb[16].mxu1 %vm410_vm1, %v1809_v11 }
 0xa1b   : > { %3482 = vrot.lane.b32.xlu0 %v3471_v7, %s3592_s16  ;;  %3258 = vmatprep.mubr.msk.f32.mxu1 %vm3588_vm0, %v3587_v0 }
 0xa1f   : > { %1811 = vrot.lane.b32.xlu0 %v1809_v11, %s3590_s14 }
 0xa23   : > { %1813 = vrot.lane.b32.xlu0 %v1809_v11, %s3591_s15 }
 0xa27   : > { %1815 = vrot.lane.b32.xlu0 %v1809_v11, %s3592_s16 }
 0xa85   : > { %v3473_v12 = vpop.permute.xlu0 %3472 }
 0xa86   : > { %v3475_v13 = vunpack.i.h.bf16 %v3473_v12  ;;  %v3474_v14 = vunpack.i.l.bf16 %v3473_v12 }
 0xa88   : > { %v3382_v15 = vpack.c.bf16 %v3475_v13, %v3474_v14 }
 0xa89   : > { %v3888_v16 = vpop.permute.xlu0 %3477 }
 0xa8a   : > { %v3480_v17 = vunpack.i.h.bf16 %v3888_v16  ;;  %v3479_v18 = vunpack.i.l.bf16 %v3888_v16  ;;  %3384 = vmatpush3.bf16.xpose.msk.msra.mxu0 %vm3872_vm5, %v3382_v15 }
 0xa8b   : > { %3389 = vmatprep.subr.bf16.mxu0 %v3589_v1 }
 0xa8c   : > { %v3386_v19 = vpack.c.bf16 %v3480_v17, %v3479_v18 }
 0xa8d   : > { %v3483_v20 = vpop.permute.xlu0 %3482 }
 0xa8e   : > { %v3485_v21 = vunpack.i.h.bf16 %v3483_v20  ;;  %v3484_v22 = vunpack.i.l.bf16 %v3483_v20  ;;  %3388 = vmatpush3.bf16.xpose.msk.msra.mxu1 %vm3872_vm5, %v3386_v19 }
 0xa8f   : > { %3393 = vmatprep.subr.bf16.mxu1 %v3589_v1 }
 0xa90   : > { %v3390_v23 = vpack.c.bf16 %v3485_v21, %v3484_v22 }
 0xa91   : > { %v1812_v24 = vpop.permute.xlu0 %1811 }
 0xa92   : > { %3252 = vmatmul.mubr.msk.f32.vlgmr.msra.gmra.mrb[16].mxu0 %vm410_vm1, %v1812_v24 }
 0xa93   : > { %3392 = vmatpush3.bf16.xpose.msk.msra.mxu0 %vm3872_vm5, %v3390_v23  ;;  %3265 = vmatprep.mubr.msk.f32.mxu0 %vm3588_vm0, %v3587_v0 }
 0xa94   : > { %3399 = vmatprep.subr.bf16.mxu0 %v3589_v1 }
 0xa95   : > { %v1814_v25 = vpop.permute.xlu0 %1813 }
 0xa96   : > { %3259 = vmatmul.mubr.msk.f32.vlgmr.msra.gmra.mrb[18].mxu1 %vm410_vm1, %v1814_v25 }
 0xa97   : > { %3272 = vmatprep.mubr.msk.f32.mxu1 %vm3588_vm0, %v3587_v0 }
 0xa99   : > { %v1816_v26 = vpop.permute.xlu0 %1815 }
 0xa9a   : > { %3266 = vmatmul.mubr.msk.f32.vlgmr.msra.gmra.mrb[18].mxu0 %vm410_vm1, %v1816_v26 }
 0xa9b   : > { %3286 = vmatprep.mubr.msk.f32.mxu0 %vm3588_vm0, %v3587_v0 }
 0xaed   : > { %v1903_v27 = vpop.f32.mrb[16].mxu1 }
 0xaee   : > { %v3246_v28 = vpop.f32.mrb[17].mxu1  ;;  %v2135_v43 = vsel %vm1510_vm3, %v1903_v27, -inf }
 0xaef   : > { %2136 = vmax.xlane.f32.xlu0 %v2135_v43  ;;  %v1626_v28 = vld [vmem:[#allocation2 + $0xb0] sm:$0xff]  ;;  %v1627_v43 = vld [vmem:[#allocation2 + $0xb8] sm:$0xff] }
 0xb65   : > { %v1979_v29 = vpop.f32.mrb[16].mxu0 }
 0xb66   : > { %v3253_v30 = vpop.f32.mrb[17].mxu0  ;;  %v2138_v31 = vsel %vm1510_vm3, %v1979_v29, -inf }
 0xb67   : > { %2139 = vmax.xlane.f32.xlu1 %v2138_v31  ;;  %v1628_v30 = vld [vmem:[#allocation2 + $0xc0] sm:$0xff]  ;;  %v1629_v31 = vld [vmem:[#allocation2 + $0xc8] sm:$0xff] }
 0xb69   : > { %v2055_v32 = vpop.f32.mrb[18].mxu1 }
 0xb6a   : > { %v3260_v33 = vpop.f32.mrb[19].mxu1  ;;  %v2141_v34 = vsel %vm1510_vm3, %v2055_v32, -inf }
 0xb6b   : > { %2142 = vmax.xlane.f32.xlu0 %v2141_v34 }
 0xb6d   : > { %v2131_v35 = vpop.f32.mrb[18].mxu0 }
 0xb6e   : > { %v3267_v36 = vpop.f32.mrb[19].mxu0  ;;  %v2144_v37 = vsel %vm1510_vm3, %v2131_v35, -inf }
 0xb6f   : > { %2145 = vmax.xlane.f32.xlu0 %v2144_v37 }
 0xb78   : > { %3492 = vrot.lane.b32.xlu1 %v3473_v12, %s3593_s17 }
 0xb7c   : > { %3502 = vrot.lane.b32.xlu1 %v3483_v20, %s3593_s17  ;;  %v2137_v38 = vpop.xlane.xlu0 %2136 }
 0xb7d   : > { %v2147_v39 = vsub.f32 %v1903_v27, %v2137_v38 }
 0xb7f   : > { %v2151_v40 = vmul.f32 1.442695, %v2147_v39 }
 0xb81   : > { %3524 = vpow2.f32 %v2151_v40 }
 0xb85   : > { %3487 = vrot.lane.b32.xlu0 %v3471_v7, %s3593_s17 }
 0xb8b   : > { %v3525_v41 = vpop.eup %3524 }
 0xb8c   : > { %v2159_v42 = vsel %vm1510_vm3, %v3525_v41, 0.0 }
 0xba4   : > { %2160 = vadd.xlane.f32.xlu0 %v2159_v42 }
 0xbf4   : > { %v2140_v45 = vpop.xlane.xlu1 %2139 }
 0xbf5   : > { %v2148_v46 = vsub.f32 %v1979_v29, %v2140_v45  ;;  %v3406_v29 = vpack.c.bf16 %v1627_v43, %v1626_v28 }
 0xbf7   : > { %v2153_v48 = vmul.f32 1.442695, %v2148_v46 }
 0xbf8   : > { %v2143_v51 = vpop.xlane.xlu0 %2142  ;;  %v3493_v4 = vpop.permute.xlu1 %3492 }
 0xbf9   : > { %3526 = vpow2.f32 %v2153_v48  ;;  %v2149_v52 = vsub.f32 %v2055_v32, %v2143_v51  ;;  %v3495_v5 = vunpack.i.h.bf16 %v3493_v4  ;;  %v3494_v6 = vunpack.i.l.bf16 %v3493_v4  ;;  %v3012_v48 = vld [vmem:[%s3997_s5 + $0x7] ss:$0 sm:$0xff] }
 0xbfa   : > { %v3409_v32 = vpack.c.bf16 %v1629_v31, %v1628_v30 }
 0xbfb   : > { %v2155_v53 = vmul.f32 1.442695, %v2149_v52  ;;  %v3397_v44 = vpack.c.bf16 %v3495_v5, %v3494_v6  ;;  %v2699_v5 = vld [vmem:[#allocation2 + $0x108] sm:$0xff] }
 0xbfc   : > { %v2146_v54 = vpop.xlane.xlu0 %2145  ;;  %v3503_v11 = vpop.permute.xlu1 %3502 }
 0xbfd   : > { %3528 = vpow2.f32 %v2155_v53  ;;  %v2150_v47 = vsub.f32 %v2131_v35, %v2146_v54  ;;  %v3505_v13 = vunpack.i.h.bf16 %v3503_v11  ;;  %v3504_v14 = vunpack.i.l.bf16 %v3503_v11 }
 0xbff   : > { %v2157_v50 = vmul.f32 1.442695, %v2150_v47  ;;  %v3403_v18 = vpack.c.bf16 %v3505_v13, %v3504_v14  ;;  %v3014_v13 = vld [vmem:[%s3997_s5 + $0xc] ss:$0 sm:$0xff] }
 0xc00   : > { %v3488_v55 = vpop.permute.xlu0 %3487 }
 0xc01   : > { %3530 = vpow2.f32 %v2157_v50  ;;  %v3490_v56 = vunpack.i.h.bf16 %v3488_v55  ;;  %v3489_v57 = vunpack.i.l.bf16 %v3488_v55 }
 0xc03   : > { %v3527_v58 = vpop.eup %3526  ;;  %v3394_v59 = vpack.c.bf16 %v3490_v56, %v3489_v57 }
 0xc04   : > { %v2162_v60 = vsel %vm1510_vm3, %v3527_v58, 0.0 }
 0xc05   : > { %2163 = vadd.xlane.f32.xlu0 %v2162_v60  ;;  %3395 = vmatpush3.bf16.msra.mxu1 %v3394_v59  ;;  %v2614_v59 = vld [vmem:[#allocation2 + $0xd8] sm:$0xff] }
 0xc06   : > { %3396 = vmatprep.subr.bf16.mxu1 %v3589_v1 }
 0xc07   : > { %v3529_v61 = vpop.eup %3528 }
 0xc08   : > { %v2165_v49 = vsel %vm1510_vm3, %v3529_v61, 0.0 }
 0xc09   : > { %2166 = vadd.xlane.f32.xlu0 %v2165_v49  ;;  %v2616_v49 = vld [vmem:[#allocation2 + $0xe8] sm:$0xff] }
 0xc0b   : > { %v3531_v63 = vpop.eup %3530 }
 0xc0c   : > { %v2168_v2 = vsel %vm1510_vm3, %v3531_v63, 0.0 }
 0xc0d   : > { %2169 = vadd.xlane.f32.xlu0 %v2168_v2  ;;  %v2697_v2 = vld [vmem:[#allocation2 + $0xf8] sm:$0xff] }
 0xc23   : > { %3497 = vrot.lane.b32.xlu0 %v3888_v16, %s3593_s17 }
 0xc31   : > { %v2161_v3 = vpop.xlane.xlu0 %2160 }
 0xc32   : > { %3532 = vrcp.f32 %v2161_v3  ;;  %v2698_v3 = vld [vmem:[#allocation2 + $0x100] sm:$0xff] }
 0xc33   : > { %v3421_v6 = vpack.c.bf16 %v2699_v5, %v2698_v3 }
 0xc3c   : > { %v3533_v7 = vpop.eup %3532 }
 0xc3d   : > { %v2175_v8 = vmul.f32 %v3533_v7, %v3525_v41  ;;  %v2700_v7 = vld [vmem:[#allocation2 + $0x110] sm:$0xff] }
 0xc3f   : > { %3273 = vmatmul.mubr.msk.f32.vlgmr.msra.gmra.mrb[20].mxu1 %vm1510_vm3, %v2175_v8  ;;  %v2701_v8 = vld [vmem:[#allocation2 + $0x118] sm:$0xff] }
 0xc40   : > { %3398 = vmatpush3.bf16.msra.mxu1 %v3397_v44  ;;  %3279 = vmatprep.mubr.msk.f32.mxu1 %vm3588_vm0, %v3587_v0  ;;  %v3424_v44 = vpack.c.bf16 %v2701_v8, %v2700_v7 }
 0xc41   : > { %3402 = vmatprep.subr.bf16.mxu1 %v3589_v1 }
 0xc92   : > { %v2164_v9 = vpop.xlane.xlu0 %2163 }
 0xc93   : > { %3534 = vrcp.f32 %v2164_v9 }
 0xc96   : > { %v2167_v10 = vpop.xlane.xlu0 %2166 }
 0xc97   : > { %3536 = vrcp.f32 %v2167_v10 }
 0xc9a   : > { %v2170_v12 = vpop.xlane.xlu0 %2169 }
 0xc9b   : > { %3538 = vrcp.f32 %v2170_v12 }
 0xc9d   : > { %v3535_v15 = vpop.eup %3534 }
 0xc9e   : > { %v2176_v16 = vmul.f32 %v3535_v15, %v3527_v58  ;;  %v3498_v17 = vpop.permute.xlu0 %3497  ;;  %v3015_v15 = vld [vmem:[%s3997_s5 + $0xd] ss:$0 sm:$0xff] }
 0xc9f   : > { %v3500_v19 = vunpack.i.h.bf16 %v3498_v17  ;;  %v3499_v20 = vunpack.i.l.bf16 %v3498_v17 }
 0xca0   : > { %3280 = vmatmul.mubr.msk.f32.vlgmr.msra.gmra.mrb[22].mxu1 %vm1510_vm3, %v2176_v16 }
 0xca1   : > { %v3537_v21 = vpop.eup %3536  ;;  %v3400_v22 = vpack.c.bf16 %v3500_v19, %v3499_v20  ;;  %3404 = vmatpush3.bf16.msra.mxu1 %v3403_v18  ;;  %3293 = vmatprep.mubr.msk.f32.mxu1 %vm3588_vm0, %v3587_v0  ;;  %v2702_v18 = vld [vmem:[#allocation2 + $0x120] sm:$0xff]  ;;  %v3016_v20 = vld [vmem:[%s3997_s5 + $0x8] ss:$0 sm:$0xff] }
 0xca2   : > { %3411 = vmatprep.subr.bf16.mxu1 %v3589_v1  ;;  %v2177_v23 = vmul.f32 %v3537_v21, %v3529_v61  ;;  %v2615_v61 = vld [vmem:[#allocation2 + $0xe0] sm:$0xff] }
 0xca3   : > { %3401 = vmatpush3.bf16.msra.mxu0 %v3400_v22 }
 0xca4   : > { %3405 = vmatprep.subr.bf16.mxu0 %v3589_v1 }
 0xca5   : > { %v3539_v24 = vpop.eup %3538 }
 0xca6   : > { %v2178_v25 = vmul.f32 %v3539_v24, %v3531_v63  ;;  %3287 = vmatmul.mubr.msk.f32.vlgmr.msra.gmra.mrb[20].mxu0 %vm1510_vm3, %v2177_v23  ;;  %v3415_v63 = vpack.c.bf16 %v2616_v49, %v2615_v61 }
 0xca7   : > { %3304 = vmatprep.mubr.msk.f32.mxu0 %vm3588_vm0, %v3587_v0  ;;  %3407 = vmatpush3.bf16.msra.mxu0 %v3406_v29 }
 0xca8   : > { %3294 = vmatmul.mubr.msk.f32.vlgmr.msra.gmra.mrb[24].mxu1 %vm1510_vm3, %v2178_v25  ;;  %3408 = vmatprep.subr.bf16.mxu0 %v3589_v1  ;;  %v3018_v25 = vld [vmem:[%s3997_s5 + $0x9] ss:$0 sm:$0xff] }
 0xca9   : > { %3315 = vmatprep.mubr.msk.f32.mxu1 %vm3588_vm0, %v3587_v0 }
 0xcab   : > { %3410 = vmatpush3.bf16.msra.mxu0 %v3409_v32 }
 0xcac   : > { %3417 = vmatprep.subr.bf16.mxu0 %v3589_v1 }
 0xd12   : > { %v2254_v26 = vpop.f32.mrb[20].mxu1 }
 0xd13   : > { %v3274_v27 = vpop.f32.mrb[21].mxu1 }
 0xd73   : > { %v2333_v33 = vpop.f32.mrb[22].mxu1 }
 0xd74   : > { %2496 = vrot.lane.b32.xlu0 %v2333_v33, %s3595_s19  ;;  %v3281_v34 = vpop.f32.mrb[23].mxu1 }
 0xd79   : > { %v2412_v35 = vpop.f32.mrb[20].mxu0 }
 0xd7a   : > { %2500 = vrot.lane.b32.xlu1 %v2412_v35, %s3596_s20  ;;  %v3288_v36 = vpop.f32.mrb[21].mxu0 }
 0xd7b   : > { %v2491_v37 = vpop.f32.mrb[24].mxu1 }
 0xd7c   : > { %2504 = vrot.lane.b32.xlu0 %v2491_v37, %s3597_s23  ;;  %v3295_v38 = vpop.f32.mrb[25].mxu1 }
 0xde6   : > { %v2497_v39 = vpop.permute.xlu0 %2496 }
 0xde7   : > { %v2507_v40 = vsel %vm410_vm1, %v2254_v26, %v2497_v39  ;;  %v3020_v39 = vld [vmem:[%s3997_s5 + $0xe] ss:$0 sm:$0xff] }
 0xdec   : > { %v2501_v41 = vpop.permute.xlu1 %2500 }
 0xded   : > { %v2508_v42 = vsel %vm1510_vm3, %v2507_v40, %v2501_v41  ;;  %v3021_v41 = vld [vmem:[%s3997_s5 + $0xf] ss:$0 sm:$0xff] }
 0xdee   : > { %v2505_v45 = vpop.permute.xlu0 %2504 }
 0xdef   : > { %v2509_v46 = vsel %vm1512_vm4, %v2508_v42, %v2505_v45 }
 0xdf0   : > { %3305 = vmatmul.mubr.msk.f32.vlgmr.msra.gmra.mrb[22].mxu0 %vm489_vm2, %v2509_v46 }
 0xdf1   : > { %3334 = vmatprep.mubr.msk.f32.mxu0 %vm3588_vm0, %v3587_v0  ;;  %v2613_v0 = vld [vmem:[#allocation2 + $0xd0] sm:$0xff] }
 0xdf2   : > { %v3412_v60 = vpack.c.bf16 %v2614_v59, %v2613_v0 }
 0xdf4   : > { %3413 = vmatpush3.bf16.msra.mxu1 %v3412_v60 }
 0xdf5   : > { %3414 = vmatprep.subr.bf16.mxu1 %v3589_v1 }
 0xdf8   : > { %3416 = vmatpush3.bf16.msra.mxu1 %v3415_v63 }
 0xec3   : > { %v2583_v51 = vpop.f32.mrb[22].mxu0 }
 0xec4   : > { %v2584_v52 = vadd.f32 %v3012_v48, %v2583_v51  ;;  %v3306_v53 = vpop.f32.mrb[23].mxu0 }
 0xec6   : > { %v2587_v54 = vadd.f32 %v2584_v52, %v3863_v62  ;;  %v2696_v62 = vld [vmem:[#allocation2 + $0xf0] sm:$0xff] }
 0xec7   : > { %v3418_v4 = vpack.c.bf16 %v2697_v2, %v2696_v62 }
 0xec8   : > { %v2590_v47 = vsel %vm489_vm2, %v2587_v54, 0.0 }
 0xec9   : > { %2591 = vadd.xlane.f32.xlu1 %v2590_v47  ;;  %3419 = vmatpush3.bf16.msra.mxu0 %v3418_v4 }
 0xeca   : > { %3420 = vmatprep.subr.bf16.mxu0 %v3589_v1 }
 0xecd   : > { %3422 = vmatpush3.bf16.msra.mxu0 %v3421_v6 }
 0xece   : > { %3423 = vmatprep.subr.bf16.mxu0 %v3589_v1 }
 0xed1   : > { %3425 = vmatpush3.bf16.msra.mxu0 %v3424_v44 }
 0xed2   : > { %3426 = vmatprep.subr.bf16.mxu0 %v3589_v1  ;;  %v2703_v1 = vld [vmem:[#allocation2 + $0x128] sm:$0xff] }
 0xed3   : > { %v3427_v19 = vpack.c.bf16 %v2703_v1, %v2702_v18 }
 0xed5   : > { %3428 = vmatpush3.bf16.msra.mxu0 %v3427_v19 }
 0xf56   : > { %v2592_v50 = vpop.xlane.xlu1 %2591 }
 0xf57   : > { %v2593_v55 = vmul.f32 0.03125, %v2592_v50 }
 0xf59   : > { %v2594_v56 = vsub.f32 %v2587_v54, %v2593_v55 }
 0xf5b   : > { %v2595_v57 = vmul.f32 %v2594_v56, %v2594_v56 }
 0xf5d   : > { %v2596_v58 = vsel %vm489_vm2, %v2595_v57, 0.0 }
 0xf5e   : > { %2597 = vadd.xlane.f32.xlu0 %v2596_v58 }
 0xfeb   : > { %v2598_v9 = vpop.xlane.xlu0 %2597 }
 0xfec   : > { %v2599_v10 = vmul.f32 0.03125, %v2598_v9 }
 0xfee   : > { %v2600_v11 = vadd.f32 1e-05, %v2599_v10 }
 0xff0   : > { %3540 = vrsqrt.f32 %v2600_v11 }
 0xffa   : > { %v3541_v12 = vpop.eup %3540 }
 0xffb   : > { %v2602_v14 = vmul.f32 %v3541_v12, %v2594_v56 }
 0xffd   : > { %v2607_v16 = vmul.f32 %v3014_v13, %v2602_v14 }
 0xfff   : > { %v2612_v17 = vadd.f32 %v3015_v15, %v2607_v16 }
0x1001   : > { %3316 = vmatmul.mubr.msk.f32.vlgmr.msra.gmra.mrb[26].mxu1 %vm489_vm2, %v2612_v17 }
0x10d4   : > { %v2691_v21 = vpop.f32.mrb[26].mxu1 }
0x10d5   : > { %v2692_v22 = vadd.f32 %v3016_v20, %v2691_v21  ;;  %v3317_v23 = vpop.f32.mrb[27].mxu1 }
0x10d7   : > { %v2695_v24 = vmax.f32 %v2692_v22, 0.0 }
0x10d9   : > { %3335 = vmatmul.mubr.msk.f32.vlgmr.msra.gmra.mrb[24].mxu0 %vm2709_vm6, %v2695_v24 }
0x11ac   : > { %v2779_v26 = vpop.f32.mrb[24].mxu0 }
0x11ad   : > { %v2780_v27 = vadd.f32 %v3018_v25, %v2779_v26  ;;  %v3336_v28 = vpop.f32.mrb[25].mxu0 }
0x11af   : > { %v2783_v43 = vadd.f32 %v2780_v27, %v2612_v17 }
0x11b1   : > { %v2786_v29 = vsel %vm489_vm2, %v2783_v43, 0.0 }
0x11b2   : > { %2787 = vadd.xlane.f32.xlu0 %v2786_v29 }
0x123f   : > { %v2788_v30 = vpop.xlane.xlu0 %2787 }
0x1240   : > { %v2789_v31 = vmul.f32 0.03125, %v2788_v30 }
0x1242   : > { %v2790_v32 = vsub.f32 %v2783_v43, %v2789_v31 }
0x1244   : > { %v2791_v33 = vmul.f32 %v2790_v32, %v2790_v32 }
0x1246   : > { %v2792_v34 = vsel %vm489_vm2, %v2791_v33, 0.0 }
0x1247   : > { %2793 = vadd.xlane.f32.xlu0 %v2792_v34 }
0x12d4   : > { %v2794_v35 = vpop.xlane.xlu0 %2793 }
0x12d5   : > { %v2795_v36 = vmul.f32 0.03125, %v2794_v35 }
0x12d7   : > { %v2796_v37 = vadd.f32 1e-05, %v2795_v36 }
0x12d9   : > { %3542 = vrsqrt.f32 %v2796_v37 }
0x12e3   : > { %v3543_v38 = vpop.eup %3542 }
0x12e4   : > { %v2798_v40 = vmul.f32 %v3543_v38, %v2790_v32 }
0x12e6   : > { %v2803_v42 = vmul.f32 %v3020_v39, %v2798_v40 }
0x12e8   : > { %v2808_v45 = vadd.f32 %v3021_v41, %v2803_v42 }
0x12ea   : > { %2809 = vxpose.xlu1.b32.start.end [1/1] (short) (narrow) %v2808_v45, 32 }
0x136a   : > { %v2825_v46 = vpop.trf.xlu1 }
0x136b   : > { %2841 = vst.msk [vmem:[%s323_s22] sm:$0xff] %vm410_vm1, %v2825_v46 }
0x136e   : > { %v2826_v48 = vpop.trf.xlu1 }
0x136f   : > { %2842 = vst.msk [vmem:[%s323_s22 + $0x8] sm:$0xff] %vm410_vm1, %v2826_v48 }
0x1372   : > { %v2827_v51 = vpop.trf.xlu1 }
0x1373   : > { %2843 = vst.msk [vmem:[%s323_s22 + $0x10] sm:$0xff] %vm410_vm1, %v2827_v51 }
0x1376   : > { %v2828_v52 = vpop.trf.xlu1 }
0x1377   : > { %2844 = vst.msk [vmem:[%s323_s22 + $0x18] sm:$0xff] %vm410_vm1, %v2828_v52 }
0x1378 PF: > { %s17_s21 = sadd.s32 1, %s3582_s21  }
0x1379   : > { %p14_p3 = scmp.ge.s32.totalorder %s17_s21, 4  }
0x137b   :  { %16 = sbr.rel (!%p14_p3) target bundleno = 1 (0x1), region = 88 }
0x1382   :  { %2866 = vsyncpa [#allocation3], 1 }
0x1383   :  { %2868 = vsyncpa [#allocation3 + $0x1], 1 }

</bundles_post_ra>
